<compile_context>
chip_gen: v5e
topology: v5e:2x2
jax: 0.10.0
libtpu: 0.0.40
codegen_flags: <defaults>
</compile_context>

<pallas_src>
import functools
import math

import numpy as np
import jax
import jax.numpy as jnp
from jax.experimental import pallas as pl
from jax.experimental.pallas import tpu as pltpu


# ----------------------------------------------------------------------------
# small helpers
# ----------------------------------------------------------------------------
def _round_up(v, m):
    return ((v + m - 1) // m) * m


_MM_VMEM_LIMIT = 32 * 1024 * 1024     # explicit; < 64 MiB physical on v7x


def _pick_tiles(mp, kp, np_, w_itemsize):
    """Tiles for weight-streaming matmuls (tiny M, K<=1024, large N).

    Full-K blocks collapse the K grid; N tiles are maximized under an
    explicit double-buffered-weight budget so the weight stream is read once
    with few grid steps on every TPU generation.
    """
    if mp % 128 == 0:
        tm = 256 if mp % 256 == 0 else 128
        tm = min(tm, mp)
    else:
        tm = mp                          # tiny M (8/16): full rows
    tk = kp if kp <= 1024 else 512
    if kp % tk:
        tk = kp
    w_dbuf_cap = 10 << 20                # double-buffered weight block budget
    total_cap = 24 << 20                 # weight + out + acc + x budget
    for tn in (16384, 8192, 4096, 2048, 1024, 512, 256, 128):
        if np_ % tn:
            continue
        w_dbuf = tk * tn * w_itemsize * 2
        out_dbuf = tm * tn * 4 * 2
        acc = tm * tn * 4
        x_dbuf = tm * tk * 4 * 2
        if w_dbuf <= w_dbuf_cap and (w_dbuf + out_dbuf + acc + x_dbuf) <= total_cap:
            return tm, tk, tn
    return tm, tk, 128


# ----------------------------------------------------------------------------
# Pallas kernel 1: tiled matmul with fused bias + activation (none/leaky/exp).
# Weights may be bf16 (LHS cast in-kernel), accumulation is always f32.
# ----------------------------------------------------------------------------
def _mm_kernel(x_ref, w_ref, b_ref, o_ref, acc_ref, *, act):
    @pl.when(pl.program_id(2) == 0)
    def _():
        acc_ref[...] = jnp.zeros_like(acc_ref)

    x = x_ref[...]
    if w_ref.dtype != x.dtype:
        x = x.astype(w_ref.dtype)
    acc_ref[...] += jnp.dot(x, w_ref[...], preferred_element_type=jnp.float32)

    @pl.when(pl.program_id(2) == pl.num_programs(2) - 1)
    def _():
        r = acc_ref[...] + b_ref[...]
        if act == "leaky":
            r = jnp.where(r > 0, r, 0.2 * r)
        elif act == "exp":
            r = jnp.exp(r)
        o_ref[...] = r.astype(o_ref.dtype)


def _matmul_padded(xp, wp, bp, act="none"):
    """xp:(Mp,Kp) f32, wp:(Kp,Np) f32/bf16, bp:(1,Np) f32. Returns (Mp,Np) f32."""
    mp, kp = xp.shape
    kp2, np_ = wp.shape
    assert kp == kp2 and bp.shape == (1, np_)
    tm, tk, tn = _pick_tiles(mp, kp, np_, jnp.dtype(wp.dtype).itemsize)
    grid = (mp // tm, np_ // tn, kp // tk)
    return pl.pallas_call(
        functools.partial(_mm_kernel, act=act),
        out_shape=jax.ShapeDtypeStruct((mp, np_), jnp.float32),
        grid_spec=pltpu.PrefetchScalarGridSpec(
            num_scalar_prefetch=0,
            grid=grid,
            in_specs=[
                pl.BlockSpec((tm, tk), lambda i, j, k: (i, k)),
                pl.BlockSpec((tk, tn), lambda i, j, k: (k, j)),
                pl.BlockSpec((1, tn), lambda i, j, k: (0, j)),
            ],
            out_specs=pl.BlockSpec((tm, tn), lambda i, j, k: (i, j)),
            scratch_shapes=[pltpu.VMEM((tm, tn), jnp.float32)],
        ),
        compiler_params=pltpu.CompilerParams(
            dimension_semantics=("parallel", "parallel", "arbitrary"),
            vmem_limit_bytes=_MM_VMEM_LIMIT),
    )(xp, wp, bp)


def pallas_linear(x, wp, bp, act="none", n_out=None):
    """y = act(x @ wp + bp); wp/bp pre-padded at init. Returns (M, n_out)."""
    m, k = x.shape
    kp, np_ = wp.shape
    mp = _round_up(m, 8)
    if mp == m and k == kp:
        xp = x
    else:
        xp = jnp.zeros((mp, kp), jnp.float32).at[:m, :k].set(x)
    out = _matmul_padded(xp, wp, bp, act)
    n = np_ if n_out is None else n_out
    return out[:m, :n]


# ----------------------------------------------------------------------------
# Pallas kernel 2: fused first-layer (all heads + template1) and block-diagonal
# tiny second layers in ONE call: h = leaky(x@W1+b1) stays in VMEM, t = h@W2+b2.
# ----------------------------------------------------------------------------
def _heads_kernel(x_ref, w1_ref, b1_ref, w2_ref, b2_ref, h_ref, t_ref):
    h = jnp.dot(x_ref[...], w1_ref[...], preferred_element_type=jnp.float32)
    h = h + b1_ref[...]
    h = jnp.where(h > 0, h, 0.2 * h)
    h_ref[...] = h
    t_ref[...] = (jnp.dot(h, w2_ref[...], preferred_element_type=jnp.float32)
                  + b2_ref[...])


def pallas_fused_heads(xp, w1, b1, w2, b2):
    mp, k = xp.shape
    n1 = w1.shape[1]
    n2 = w2.shape[1]
    return pl.pallas_call(
        _heads_kernel,
        out_shape=(jax.ShapeDtypeStruct((mp, n1), jnp.float32),
                   jax.ShapeDtypeStruct((mp, n2), jnp.float32)),
        grid_spec=pltpu.PrefetchScalarGridSpec(
            num_scalar_prefetch=0,
            grid=(1,),
            in_specs=[
                pl.BlockSpec((mp, k), lambda i: (0, 0)),
                pl.BlockSpec((k, n1), lambda i: (0, 0)),
                pl.BlockSpec((1, n1), lambda i: (0, 0)),
                pl.BlockSpec((n1, n2), lambda i: (0, 0)),
                pl.BlockSpec((1, n2), lambda i: (0, 0)),
            ],
            out_specs=[
                pl.BlockSpec((mp, n1), lambda i: (0, 0)),
                pl.BlockSpec((mp, n2), lambda i: (0, 0)),
            ],
        ),
        compiler_params=pltpu.CompilerParams(
            dimension_semantics=("arbitrary",)),
    )(xp, w1, b1, w2, b2)


# ----------------------------------------------------------------------------
# Pallas kernel 3: per-channel affine + activation epilogue
#   out = act(gamma * (y + bias) + beta)
# The wrapper repacks a narrow channel dim (e.g. Cout=4) to a 128-lane-dense
# layout (bias/gamma/beta rows tiled) to avoid masked partial stores.
# ----------------------------------------------------------------------------
def _chan_act_kernel(y_ref, b_ref, g_ref, t_ref, o_ref, *, act):
    r = g_ref[...] * (y_ref[...] + b_ref[...]) + t_ref[...]
    if act == "leaky":
        r = jnp.where(r > 0, r, 0.2 * r)
    elif act == "softplus":
        # PyTorch softplus (beta=1, threshold=20), numerically stable.
        r = jnp.where(r > 20.0, r, jnp.log(1.0 + jnp.exp(jnp.minimum(r, 20.0))))
    o_ref[...] = r


def pallas_channel_act(y, bias_row, gamma_row, beta_row, act):
    """y:(M,C) f32, M % 8 == 0; bias/gamma/beta rows: (1,C)."""
    m0, c0 = y.shape
    rep = 1
    if c0 < 128 and 128 % c0 == 0 and m0 % (128 // c0) == 0:
        rep = 128 // c0                       # lane-dense repack
    m, c = m0 // rep, c0 * rep
    y2 = y.reshape(m, c)
    b2 = jnp.tile(bias_row, (1, rep))
    g2 = jnp.tile(gamma_row, (1, rep))
    t2 = jnp.tile(beta_row, (1, rep))
    tm = m
    if m * c * 4 > (4 << 20):
        for cand in (2048, 1024, 512, 256, 128, 64, 32, 16, 8):
            if m % cand == 0 and cand * c * 4 <= (4 << 20):
                tm = cand
                break
    grid = (m // tm,)
    out = pl.pallas_call(
        functools.partial(_chan_act_kernel, act=act),
        out_shape=jax.ShapeDtypeStruct((m, c), jnp.float32),
        grid_spec=pltpu.PrefetchScalarGridSpec(
            num_scalar_prefetch=0,
            grid=grid,
            in_specs=[
                pl.BlockSpec((tm, c), lambda i: (i, 0)),
                pl.BlockSpec((1, c), lambda i: (0, 0)),
                pl.BlockSpec((1, c), lambda i: (0, 0)),
                pl.BlockSpec((1, c), lambda i: (0, 0)),
            ],
            out_specs=pl.BlockSpec((tm, c), lambda i: (i, 0)),
        ),
        compiler_params=pltpu.CompilerParams(dimension_semantics=("parallel",)),
    )(y2, b2, g2, t2)
    return out.reshape(m0, c0)


# ----------------------------------------------------------------------------
# ConvTranspose3d(k=4, s=2, p=1):
#   one Pallas matmul  P = x_flat @ W[Cin, 4*4*4*Cout]   (bf16 weight, streamed
#   exactly once), a cheap XLA "col2im" (8 parities x 8 shifted tap adds), then
#   the Pallas per-channel bias+activation epilogue.
# ----------------------------------------------------------------------------
def _ct_taps(p):
    # (input shift, kernel index) pairs for output parity p along one dim
    return [(0, p + 1), (-1, 3)] if p == 0 else [(0, 2), (1, 0)]


def conv_transpose3d(x, w2, bias_row, gamma_row, beta_row, act):
    """x:(B,D,D,D,Cin) NDHWC; w2:(Cin, 64*Cout) bf16, columns (kd,kh,kw,cout).
    Returns act(gamma*(deconv(x)+bias)+beta): (B,2D,2D,2D,Cout)."""
    B, D, _, _, Cin = x.shape
    Cout = w2.shape[1] // 64
    M = B * D ** 3
    zero_b = jnp.zeros((1, w2.shape[1]), jnp.float32)
    P = pallas_linear(x.reshape(M, Cin), w2, zero_b, act="none")     # (M, 64*Cout)
    P = P.reshape(B, D, D, D, 4, 4, 4, Cout)
    # TODO(synk): the strided scatter-add (col2im) of the per-tap outputs has no
    # clean static-BlockSpec Pallas form; it stays as XLA shifted slice-adds.
    Pp = jnp.pad(P, ((0, 0), (1, 1), (1, 1), (1, 1),
                     (0, 0), (0, 0), (0, 0), (0, 0)))
    outs = []
    for pd in range(2):
        for ph in range(2):
            for pw in range(2):
                acc = None
                for (sd, kd) in _ct_taps(pd):
                    for (sh, kh) in _ct_taps(ph):
                        for (sw, kw) in _ct_taps(pw):
                            sl = Pp[:, 1 + sd:1 + sd + D,
                                    1 + sh:1 + sh + D,
                                    1 + sw:1 + sw + D, kd, kh, kw, :]
                            acc = sl if acc is None else acc + sl
                outs.append(acc)
    Y = jnp.stack(outs, axis=0).reshape(2, 2, 2, B, D, D, D, Cout)
    Y = Y.transpose(3, 4, 0, 5, 1, 6, 2, 7).reshape(B, 2 * D, 2 * D, 2 * D, Cout)
    Yf = pallas_channel_act(Y.reshape(B * (2 * D) ** 3, Cout),
                            bias_row, gamma_row, beta_row, act)
    return Yf.reshape(B, 2 * D, 2 * D, 2 * D, Cout)


# ----------------------------------------------------------------------------
# Pallas kernel 4: AffineMixWarp trilinear interpolation + basis mixing.
#   warpedweight_i = trilinear(corners_i, fracs_i)
#   warp = sum_i ww_i * coords_i / clamp(sum_i ww_i, 0.001)
# Inputs are sublane/lane-dense: the voxel axis is packed as (V/128, 128).
#   corners (B, nb*8, Vr, 128), fracs/coords (B, nb*3, Vr, 128).
# ----------------------------------------------------------------------------
def _warp_mix_kernel(c_ref, f_ref, g_ref, o_ref, *, nb):
    tvr, L = o_ref.shape[2], o_ref.shape[3]
    num0 = jnp.zeros((tvr, L), jnp.float32)
    num1 = jnp.zeros((tvr, L), jnp.float32)
    num2 = jnp.zeros((tvr, L), jnp.float32)
    den = jnp.zeros((tvr, L), jnp.float32)
    for i in range(nb):
        fx = f_ref[0, 3 * i + 0]
        fy = f_ref[0, 3 * i + 1]
        fz = f_ref[0, 3 * i + 2]
        cfx, cfy, cfz = 1.0 - fx, 1.0 - fy, 1.0 - fz       # hoisted complements
        ww = jnp.zeros((tvr, L), jnp.float32)
        for zb in range(2):
            wz = fz if zb else cfz
            for yb in range(2):
                wzy = wz * (fy if yb else cfy)
                for xb in range(2):
                    w3 = wzy * (fx if xb else cfx)
                    k = 8 * i + zb * 4 + yb * 2 + xb
                    ww = ww + c_ref[0, k] * w3
        num0 = num0 + ww * g_ref[0, 3 * i + 0]
        num1 = num1 + ww * g_ref[0, 3 * i + 1]
        num2 = num2 + ww * g_ref[0, 3 * i + 2]
        den = den + ww
    inv = 1.0 / jnp.maximum(den, 0.001)
    o_ref[0, 0] = num0 * inv
    o_ref[0, 1] = num1 * inv
    o_ref[0, 2] = num2 * inv


def pallas_warp_mix(corners, fracs, coords, nb, tvr=64):
    B, _, Vr, L = corners.shape
    assert L == 128 and Vr % tvr == 0
    grid = (B, Vr // tvr)
    return pl.pallas_call(
        functools.partial(_warp_mix_kernel, nb=nb),
        out_shape=jax.ShapeDtypeStruct((B, 3, Vr, L), jnp.float32),
        grid_spec=pltpu.PrefetchScalarGridSpec(
            num_scalar_prefetch=0,
            grid=grid,
            in_specs=[
                pl.BlockSpec((1, nb * 8, tvr, L), lambda b, v: (b, 0, v, 0)),
                pl.BlockSpec((1, nb * 3, tvr, L), lambda b, v: (b, 0, v, 0)),
                pl.BlockSpec((1, nb * 3, tvr, L), lambda b, v: (b, 0, v, 0)),
            ],
            out_specs=pl.BlockSpec((1, 3, tvr, L), lambda b, v: (b, 0, v, 0)),
        ),
        compiler_params=pltpu.CompilerParams(
            dimension_semantics=("parallel", "parallel")),
    )(corners, fracs, coords)


# ----------------------------------------------------------------------------
# Glue (plain JAX): quaternion->rotation, grid_sample corner gather.
# ----------------------------------------------------------------------------
def quaternion_to_rotmat(q):
    theta = jnp.sqrt(1e-5 + jnp.sum(q * q, axis=-1, keepdims=True))
    q = q / theta
    w, x, y, z = q[:, 0], q[:, 1], q[:, 2], q[:, 3]
    R = jnp.stack([
        1 - 2 * (y * y + z * z), 2 * (x * y - z * w), 2 * (x * z + y * w),
        2 * (x * y + z * w), 1 - 2 * (x * x + z * z), 2 * (y * z - x * w),
        2 * (x * z - y * w), 2 * (y * z + x * w), 1 - 2 * (x * x + y * y),
    ], axis=-1)
    return R.reshape(-1, 3, 3)


def _trilinear_gather(vol, coords, R):
    """F.grid_sample(bilinear, padding_mode='border', align_corners=False):
    gather 8 corner values + fractional weights.  vol:(B,nb,R,R,R),
    coords:(B,nb,V,3) in [-1,1] with (x,y,z) ordering (x indexes W)."""
    # TODO(synk): the data-dependent corner gather has no clean Pallas TPU
    # equivalent (arbitrary dynamic gather); it stays in plain JAX.  The
    # trilinear interpolation + basis mixing run in the Pallas warp_mix kernel.
    B, nb = vol.shape[0], vol.shape[1]
    x, y, z = coords[..., 0], coords[..., 1], coords[..., 2]

    def unnorm(c):
        return jnp.clip(((c + 1.0) * R - 1.0) * 0.5, 0.0, R - 1.0)

    ux, uy, uz = unnorm(x), unnorm(y), unnorm(z)
    x0, y0, z0 = jnp.floor(ux), jnp.floor(uy), jnp.floor(uz)
    fx, fy, fz = ux - x0, uy - y0, uz - z0
    x0i, y0i, z0i = (x0.astype(jnp.int32), y0.astype(jnp.int32),
                     z0.astype(jnp.int32))
    x1i = jnp.minimum(x0i + 1, R - 1)
    y1i = jnp.minimum(y0i + 1, R - 1)
    z1i = jnp.minimum(z0i + 1, R - 1)

    volf = vol.reshape(B, nb, R * R * R)

    def g(zi, yi, xi):
        return jnp.take_along_axis(volf, (zi * R + yi) * R + xi, axis=-1)

    corners = jnp.stack(
        [g(zi, yi, xi) for zi in (z0i, z1i) for yi in (y0i, y1i)
         for xi in (x0i, x1i)], axis=2)             # (B, nb, 8, V)
    fracs = jnp.stack([fx, fy, fz], axis=2)          # (B, nb, 3, V)
    return corners, fracs


# ----------------------------------------------------------------------------
# Parameter init (deterministic, synthetic). All padding / fusing / reshaping /
# dtype casting of weights happens ONCE here, not per forward.
# ----------------------------------------------------------------------------
def init_params(key, templateres=16, n_basis=4, r_affine=32):
    keys = list(jax.random.split(key, 64))
    kit = iter(keys)

    def lin(fi, fo):
        w = jax.random.normal(next(kit), (fi, fo), jnp.float32) * (1.0 / np.sqrt(fi))
        b = jnp.zeros((fo,), jnp.float32)
        return w, b

    p = {"templateres": templateres, "nb": n_basis, "R": r_affine}

    # ---- fused first layers (all heads share encoding input, K=256) ----
    l1_names = [("warps", 128), ("warpr", 128), ("warpt", 128), ("wb", 64),
                ("gwarps", 128), ("gwarpr", 128), ("gwarpt", 128), ("t1", 1024)]
    l1 = {n: lin(256, width) for n, width in l1_names}
    offs, o = {}, 0
    for n, width in l1_names:
        offs[n] = (o, width)
        o += width
    n1p = 2048                                   # 1856 padded to a 2048 lane slab
    W1 = jnp.zeros((256, n1p), jnp.float32)
    b1 = jnp.zeros((1, n1p), jnp.float32)
    for n, width in l1_names:
        s = offs[n][0]
        W1 = W1.at[:, s:s + width].set(l1[n][0])
        b1 = b1.at[0, s:s + width].set(l1[n][1])
    p["W1"], p["b1"], p["l1_off"] = W1, b1, offs   # tiny weights: stay f32

    # ---- fused (block-diagonal) tiny second layers ----
    l2_small = [("warps", 3 * n_basis), ("warpr", 4 * n_basis),
                ("warpt", 3 * n_basis), ("gwarps", 3), ("gwarpr", 4),
                ("gwarpt", 3)]
    n2p = 128
    W2 = jnp.zeros((n1p, n2p), jnp.float32)
    b2 = jnp.zeros((1, n2p), jnp.float32)
    off2, o = {}, 0
    for n, width in l2_small:
        fin = offs[n][1]
        w, b = lin(fin, width)
        s_in = offs[n][0]
        W2 = W2.at[s_in:s_in + fin, o:o + width].set(w)
        b2 = b2.at[0, o:o + width].set(b)
        off2[n] = (o, width)
        o += width
    p["W2"], p["b2"], p["l2_off"] = W2, b2, off2

    # ---- weightbranch second layer (K=64 unpadded; bf16 weight stream) ----
    wbw, wbb = lin(64, n_basis * r_affine ** 3)
    p["Wwb"], p["bwb"] = wbw.astype(jnp.bfloat16), wbb.reshape(1, -1)

    # ---- ConvTemplate deconv stack (bf16 weight streams) ----
    chan_pairs = []
    inch, outch = 1024, 512
    for _ in range(int(math.log2(templateres)) - 1):
        chan_pairs.append((inch, outch))
        if inch == outch:
            outch = inch // 2
        else:
            inch = outch
    chan_pairs.append((inch, 4))
    convs = []
    for (ci, co) in chan_pairs:
        w = jax.random.normal(next(kit), (ci, co, 4, 4, 4), jnp.float32) \
            * (1.0 / np.sqrt(ci * 8))
        # (Cin, Cout, kd, kh, kw) -> (Cin, kd*kh*kw*Cout), columns (kd,kh,kw,cout)
        w2 = jnp.transpose(w, (0, 2, 3, 4, 1)).reshape(ci, 64 * co)
        convs.append({"w2": w2.astype(jnp.bfloat16),
                      "b": jnp.zeros((1, co), jnp.float32),
                      "cin": ci, "cout": co})
    p["convs"] = convs

    # grid buffer (R,R,R,3), last dim (x,y,z), x fastest spatial axis
    lin_sp = np.linspace(-1.0, 1.0, r_affine)
    zg, yg, xg = np.meshgrid(lin_sp, lin_sp, lin_sp, indexing="ij")
    p["grid"] = jnp.asarray(np.stack((xg, yg, zg), axis=-1), jnp.float32)
    return p


# ----------------------------------------------------------------------------
# Forward pass
# ----------------------------------------------------------------------------
def decoder_forward(params, encoding, viewpos):
    B = encoding.shape[0]
    T = params["templateres"]
    nb, R = params["nb"], params["R"]
    V = R ** 3

    # computed as in the reference forward (unused: not view-conditioned)
    viewdir = viewpos / jnp.sqrt(jnp.sum(viewpos ** 2, axis=-1, keepdims=True))
    del viewdir

    # ---- ONE fused pallas_call: first-layer MLP for every head + template1,
    #      plus the block-diagonal tiny second layers ----
    mp = _round_up(B, 8)
    xp = jnp.zeros((mp, 256), jnp.float32).at[:B].set(encoding)
    h_pad, t_pad = pallas_fused_heads(xp, params["W1"], params["b1"],
                                      params["W2"], params["b2"])
    t_all = t_pad[:B]
    off2 = params["l2_off"]

    def head(name):
        s, w = off2[name]
        return t_all[:, s:s + w]

    # ---- weightbranch second layer (exp fused into the matmul epilogue) ----
    s_wb, w_wb = params["l1_off"]["wb"]
    weight = _matmul_padded(h_pad[:, s_wb:s_wb + w_wb],
                            params["Wwb"], params["bwb"], act="exp")[:B]
    weight = weight.reshape(B, nb, R, R, R)

    # ---- template branch (ConvTemplate) + template head ----
    s_t1, w_t1 = params["l1_off"]["t1"]
    x = h_pad[:B, s_t1:s_t1 + w_t1].reshape(B, 1, 1, 1, 1024)     # NDHWC
    convs = params["convs"]
    scale_row = jnp.array([[25.0, 25.0, 25.0, 1.0]], jnp.float32)
    tbias_row = jnp.array([[100.0, 100.0, 100.0, 0.0]], jnp.float32)
    for li, c in enumerate(convs):
        last = li == len(convs) - 1
        ones = jnp.ones((1, c["cout"]), jnp.float32)
        zeros = jnp.zeros((1, c["cout"]), jnp.float32)
        gamma = scale_row if last else ones
        beta = tbias_row if last else zeros
        act = "softplus" if last else "leaky"      # last layer = template head
        x = conv_transpose3d(x, c["w2"], c["b"], gamma, beta, act)
    template = x.transpose(0, 4, 1, 2, 3)          # (B, 4, T, T, T)

    # ---- warp branch (AffineMixWarp) ----
    warps_v = head("warps").reshape(B, nb, 3)
    warpr_v = head("warpr").reshape(B, nb, 4)
    warpt_v = head("warpt").reshape(B, nb, 3) * 0.1
    warprot = quaternion_to_rotmat(warpr_v.reshape(-1, 4)).reshape(B, nb, 3, 3)

    gridf = params["grid"].reshape(1, 1, V, 3)
    diff = gridf - warpt_v[:, :, None, :]                         # (B,nb,V,3)
    # torch: sum_c (grid - t)[c] * rot[j, c]  ->  rot applied to (grid - t)
    coords = jnp.einsum("bivc,bijc->bivj", diff, warprot)
    coords = coords * warps_v[:, :, None, :]

    corners, fracs = _trilinear_gather(weight, coords, R)
    Vr = V // 128
    coords_p = jnp.moveaxis(coords, -1, 2)                        # (B,nb,3,V)
    warp = pallas_warp_mix(corners.reshape(B, nb * 8, Vr, 128),
                           fracs.reshape(B, nb * 3, Vr, 128),
                           coords_p.reshape(B, nb * 3, Vr, 128),
                           nb)
    warp = warp.reshape(B, 3, R, R, R)

    # ---- global warp ----
    gwarps = 1.0 * jnp.exp(0.05 * head("gwarps"))
    gwarpr = head("gwarpr") * 0.1
    gwarpt = head("gwarpt") * 0.025
    gwarprot = quaternion_to_rotmat(gwarpr.reshape(-1, 4)).reshape(B, 3, 3)

    losses = {}  # losslist=[] -> no 'tvl1' term
    return {"template": template, "warp": warp, "gwarps": gwarps,
            "gwarprot": gwarprot, "gwarpt": gwarpt, "losses": losses}


if __name__ == "__main__":
    key = jax.random.PRNGKey(0)
    kenc, kvp, kpar = jax.random.split(key, 3)

    B = 2
    TEMPLATERES = 16
    N_BASIS = 4
    R_AFFINE = 32

    encoding = jax.random.normal(kenc, (B, 256), jnp.float32)
    viewpos = jax.random.normal(kvp, (B, 3), jnp.float32)
    params = init_params(kpar, TEMPLATERES, N_BASIS, R_AFFINE)

    out = decoder_forward(params, encoding, viewpos)
    out = jax.block_until_ready(out)

    assert out["template"].shape == (B, 4, TEMPLATERES, TEMPLATERES, TEMPLATERES)
    assert out["warp"].shape == (B, 3, R_AFFINE, R_AFFINE, R_AFFINE)
    assert out["gwarps"].shape == (B, 3)
    assert out["gwarprot"].shape == (B, 3, 3)
    assert out["gwarpt"].shape == (B, 3)
    for name in ("template", "warp", "gwarps", "gwarprot", "gwarpt"):
        assert bool(jnp.all(jnp.isfinite(out[name]))), name
    print("KERNEL_OK")
</pallas_src>

<mosaic_0001>
module attributes {stable_mosaic.version = 11 : i64} {
  func.func @_heads_kernel(%arg0: i32, %arg1: memref<8x256xf32, #tpu.memory_space<vmem>>, %arg2: memref<256x2048xf32, #tpu.memory_space<vmem>>, %arg3: memref<1x2048xf32, #tpu.memory_space<vmem>>, %arg4: memref<2048x128xf32, #tpu.memory_space<vmem>>, %arg5: memref<1x128xf32, #tpu.memory_space<vmem>>, %arg6: memref<8x2048xf32, #tpu.memory_space<vmem>>, %arg7: memref<8x128xf32, #tpu.memory_space<vmem>>) attributes {dimension_semantics = [#tpu.dimension_semantics<arbitrary>], iteration_bounds = array<i64: 1>, scalar_prefetch = 0 : i64, scratch_operands = 0 : i64, tpu.core_type = #tpu.core_type<tc>, window_params = [{pipeline_mode = #tpu.pipeline_mode<synchronous>, transform_indices = @transform_0, window_bounds = array<i64: 8, 256>}, {pipeline_mode = #tpu.pipeline_mode<synchronous>, transform_indices = @transform_1, window_bounds = array<i64: 256, 2048>}, {pipeline_mode = #tpu.pipeline_mode<synchronous>, transform_indices = @transform_2, window_bounds = array<i64: 1, 2048>}, {pipeline_mode = #tpu.pipeline_mode<synchronous>, transform_indices = @transform_3, window_bounds = array<i64: 2048, 128>}, {pipeline_mode = #tpu.pipeline_mode<synchronous>, transform_indices = @transform_4, window_bounds = array<i64: 1, 128>}, {pipeline_mode = #tpu.pipeline_mode<synchronous>, transform_indices = @transform_5, window_bounds = array<i64: 8, 2048>}, {pipeline_mode = #tpu.pipeline_mode<synchronous>, transform_indices = @transform_6, window_bounds = array<i64: 8, 128>}]} {
    %c0 = arith.constant 0 : index
    %c0_0 = arith.constant 0 : index
    %0 = vector.load %arg1[%c0, %c0_0] : memref<8x256xf32, #tpu.memory_space<vmem>>, vector<8x256xf32>
    %c0_1 = arith.constant 0 : index
    %c0_2 = arith.constant 0 : index
    %1 = vector.load %arg2[%c0_1, %c0_2] : memref<256x2048xf32, #tpu.memory_space<vmem>>, vector<256x2048xf32>
    %cst = arith.constant dense<0.000000e+00> : vector<8x2048xf32>
    %2 = tpu.matmul %0, %1, %cst {dimension_numbers = #tpu.dot_dimension_numbers<[1], [0], [0], [1], [0, 0, 1, 1], [], []>} : vector<8x256xf32>, vector<256x2048xf32>, vector<8x2048xf32> -> vector<8x2048xf32>
    %c0_3 = arith.constant 0 : index
    %c0_4 = arith.constant 0 : index
    %3 = vector.load %arg3[%c0_3, %c0_4] : memref<1x2048xf32, #tpu.memory_space<vmem>>, vector<1x2048xf32>
    %4 = vector.broadcast %3 : vector<1x2048xf32> to vector<8x2048xf32>
    %5 = arith.addf %2, %4 : vector<8x2048xf32>
    %cst_5 = arith.constant 0.000000e+00 : f32
    %6 = vector.broadcast %cst_5 : f32 to vector<8x2048xf32>
    %7 = arith.cmpf ogt, %5, %6 : vector<8x2048xf32>
    %cst_6 = arith.constant 2.000000e-01 : f32
    %8 = vector.broadcast %cst_6 : f32 to vector<8x2048xf32>
    %9 = arith.mulf %8, %5 : vector<8x2048xf32>
    %10 = arith.select %7, %5, %9 : vector<8x2048xi1>, vector<8x2048xf32>
    %c0_7 = arith.constant 0 : index
    %c0_8 = arith.constant 0 : index
    %11 = vector.load %arg6[%c0_7, %c0_8] : memref<8x2048xf32, #tpu.memory_space<vmem>>, vector<8x2048xf32>
    tpu.vector_store %arg6[%c0_7, %c0_8], %10 {strides = array<i32>} : memref<8x2048xf32, #tpu.memory_space<vmem>>, vector<8x2048xf32>,
    %c0_9 = arith.constant 0 : index
    %c0_10 = arith.constant 0 : index
    %12 = vector.load %arg4[%c0_9, %c0_10] : memref<2048x128xf32, #tpu.memory_space<vmem>>, vector<2048x128xf32>
    %cst_11 = arith.constant dense<0.000000e+00> : vector<8x128xf32>
    %13 = tpu.matmul %10, %12, %cst_11 {dimension_numbers = #tpu.dot_dimension_numbers<[1], [0], [0], [1], [0, 0, 1, 1], [], []>} : vector<8x2048xf32>, vector<2048x128xf32>, vector<8x128xf32> -> vector<8x128xf32>
    %c0_12 = arith.constant 0 : index
    %c0_13 = arith.constant 0 : index
    %14 = vector.load %arg5[%c0_12, %c0_13] : memref<1x128xf32, #tpu.memory_space<vmem>>, vector<1x128xf32>
    %15 = vector.broadcast %14 : vector<1x128xf32> to vector<8x128xf32>
    %16 = arith.addf %13, %15 : vector<8x128xf32>
    %c0_14 = arith.constant 0 : index
    %c0_15 = arith.constant 0 : index
    %17 = vector.load %arg7[%c0_14, %c0_15] : memref<8x128xf32, #tpu.memory_space<vmem>>, vector<8x128xf32>
    tpu.vector_store %arg7[%c0_14, %c0_15], %16 {strides = array<i32>} : memref<8x128xf32, #tpu.memory_space<vmem>>, vector<8x128xf32>,
    return
  }
  func.func @transform_0(%arg0: i32) -> (i32, i32) {
    %c0_i32 = arith.constant 0 : i32
    %c0_i32_0 = arith.constant 0 : i32
    %c0_i32_1 = arith.constant 0 : i32
    return %c0_i32, %c0_i32_0 : i32, i32
  }
  func.func @transform_1(%arg0: i32) -> (i32, i32) {
    %c0_i32 = arith.constant 0 : i32
    %c0_i32_0 = arith.constant 0 : i32
    %c0_i32_1 = arith.constant 0 : i32
    return %c0_i32, %c0_i32_0 : i32, i32
  }
  func.func @transform_2(%arg0: i32) -> (i32, i32) {
    %c0_i32 = arith.constant 0 : i32
    %c0_i32_0 = arith.constant 0 : i32
    %c0_i32_1 = arith.constant 0 : i32
    return %c0_i32, %c0_i32_0 : i32, i32
  }
  func.func @transform_3(%arg0: i32) -> (i32, i32) {
    %c0_i32 = arith.constant 0 : i32
    %c0_i32_0 = arith.constant 0 : i32
    %c0_i32_1 = arith.constant 0 : i32
    return %c0_i32, %c0_i32_0 : i32, i32
  }
  func.func @transform_4(%arg0: i32) -> (i32, i32) {
    %c0_i32 = arith.constant 0 : i32
    %c0_i32_0 = arith.constant 0 : i32
    %c0_i32_1 = arith.constant 0 : i32
    return %c0_i32, %c0_i32_0 : i32, i32
  }
  func.func @transform_5(%arg0: i32) -> (i32, i32) {
    %c0_i32 = arith.constant 0 : i32
    %c0_i32_0 = arith.constant 0 : i32
    %c0_i32_1 = arith.constant 0 : i32
    return %c0_i32, %c0_i32_0 : i32, i32
  }
  func.func @transform_6(%arg0: i32) -> (i32, i32) {
    %c0_i32 = arith.constant 0 : i32
    %c0_i32_0 = arith.constant 0 : i32
    %c0_i32_1 = arith.constant 0 : i32
    return %c0_i32, %c0_i32_0 : i32, i32
  }
}

</mosaic_0001>

<bundles_post_ra>
// kernel: tpu_custom_call.1
= control target key start
LH: loop header
LB: loop body
LE: loop exit
PB: predicated region body
PF: predicated region fallthrough
CT: control target
= control target key end

     0   :  { %12 = vsyncpa [#allocation3], 0  ;;  %s2323_s0 = inlined_call_operand.hbm [shape: f32[8,256], index: 0, kind: input, shape index: {}]   ;;  %s2324_s1 = inlined_call_operand.hbm [shape: f32[256,2048], index: 1, kind: input, shape index: {}]   ;;  %s2325_s2 = inlined_call_operand.hbm [shape: f32[1,2048], index: 2, kind: input, shape index: {}]   ;;  %s2326_s3 = inlined_call_operand.hbm [shape: f32[2048,128], index: 3, kind: input, shape index: {}]   ;;  %s2327_s4 = inlined_call_operand.hbm [shape: f32[1,128], index: 4, kind: input, shape index: {}]   ;;  %s2328_s5 = inlined_call_operand.hbm [shape: f32[8,2048], index: 5, kind: output, shape index: {0}]   ;;  %s2329_s6 = inlined_call_operand.hbm [shape: f32[8,128], index: 6, kind: output, shape index: {1}]  }
   0x1   :  { %13 = vsyncpa [#allocation6], 0 }
   0x2   :  { %14 = vsyncpa [#allocation9], 0 }
   0x3   :  { %15 = vsyncpa [#allocation4], 0  ;;  %s32_s23 = sshll.u32 %s2324_s1, 4  ;;  %s33_s23 = int_to_ptr.hbm [resolvable:$true] %s32_s23 }
   0x4   :  { %16 = vsyncpa [#allocation13], 0  ;;  %s2157_s24 = smov [#allocation5]   ;;  %s56_s28 = sshll.u32 %s2326_s3, 4  ;;  %s57_s28 = int_to_ptr.hbm [resolvable:$true] %s56_s28 }
   0x5   :  { %s34_s25 = sshll.u32 %s2157_s24, 4  ;;  %s2158_s29 = smov 2048   ;;  %s35_s25 = int_to_ptr.vmem [resolvable:$true] %s34_s25 }
   0x6   :  { %s2159_s30 = smov 128   ;;  %s2160_s7 = smov [#allocation8]  }
   0x7   :  { %40 = dma.hbm_to_vmem [thread:$0]  %s33_s23, 65536, %s35_s25, [#allocation6], %s2158_s29, %s2158_s29, %s2159_s30  }
   0x8   :  { %s58_s8 = sshll.u32 %s2160_s7, 4  ;;  %s22_s1 = sshll.u32 %s2323_s0, 4  ;;  %s59_s8 = int_to_ptr.vmem [resolvable:$true] %s58_s8  ;;  %s23_s1 = int_to_ptr.hbm [resolvable:$true] %s22_s1 }
   0x9   :  { %s2161_s11 = smov 8   ;;  %s2162_s12 = smov [#allocation2]  }
   0xa   :  { %64 = dma.hbm_to_vmem [thread:$0]  %s57_s28, 32768, %s59_s8, [#allocation9], %s2159_s30, %s2159_s30, %s2161_s11  }
   0xb   :  { %s24_s13 = sshll.u32 %s2162_s12, 4  ;;  %s46_s3 = sshll.u32 %s2325_s2, 4  ;;  %s25_s13 = int_to_ptr.vmem [resolvable:$true] %s24_s13  ;;  %s47_s3 = int_to_ptr.hbm [resolvable:$true] %s46_s3 }
   0xc   :  { %27 = dma.hbm_to_vmem [thread:$0]  %s23_s1, 256, %s25_s13, [#allocation3]  }
   0xd   :  { %s70_s18 = sshll.u32 %s2327_s4, 4  ;;  %s2163_s19 = smov [#allocation7]   ;;  %s71_s18 = int_to_ptr.hbm [resolvable:$true] %s70_s18 }
   0xe   :  { %s48_s20 = sshll.u32 %s2163_s19, 4  ;;  %s2164_s0 = smov [#allocation10]   ;;  %s49_s20 = int_to_ptr.vmem [resolvable:$true] %s48_s20 }
   0xf   :  { %51 = dma.hbm_to_vmem [thread:$0]  %s47_s3, 256, %s49_s20, [#allocation6]  }
  0x10   :  { %s72_s21 = sshll.u32 %s2164_s0, 4  ;;  %s73_s21 = int_to_ptr.vmem [resolvable:$true] %s72_s21 }
  0x11   :  { %75 = dma.hbm_to_vmem [thread:$0]  %s71_s18, 16, %s73_s21, [#allocation9]  }
  0x12   :  { %2147 = dma.done.wait [#allocation3], 256  }
  0x13   :  { %2148 = vsyncadd [#allocation3], 4294967040 }
  0x14   :  { %2149 = dma.done.wait [#allocation6], 65792  }
  0x15   :  { %2150 = vsyncadd [#allocation6], 4294901504 }
  0x16   :  { %2151 = dma.done.wait [#allocation9], 32784  }
  0x17   :  { %2152 = vsyncadd [#allocation9], 4294934512  ;;  %v338_v0 = vld [vmem:[#allocation5 + $0x780] sm:$0xff]  ;;  %v339_v2 = vld [vmem:[#allocation5 + $0x788] sm:$0xff]  ;;  %s1938_s22 = sshll.u32 %s2328_s5, 4  ;;  %s2165_s23 = smov [#allocation11]   ;;  %s1939_s22 = int_to_ptr.hbm [resolvable:$true] %s1938_s22 }
  0x18   :  { %v594_v1 = vld [vmem:[#allocation5 + $0xf80] sm:$0xff]  ;;  %646 = vmatpush.msra.mxu0 %v338_v0  ;;  %v595_v3 = vld [vmem:[#allocation5 + $0xf88] sm:$0xff]  ;;  %686 = vmatpush.msra.mxu2 %v339_v2  ;;  %v340_v0 = vld [vmem:[#allocation5 + $0x790] sm:$0xff]  ;;  %s1936_s24 = sshll.u32 %s2165_s23, 4  ;;  %s2166_s5 = smov [#allocation12]   ;;  %s1937_s24 = int_to_ptr.vmem [resolvable:$true] %s1936_s24 }
  0x19   :  { %666 = vmatpush.msra.mxu1 %v594_v1  ;;  %v322_v4 = vld [vmem:[#allocation5 + $0x700] sm:$0xff]  ;;  %706 = vmatpush.msra.mxu3 %v595_v3  ;;  %v323_v6 = vld [vmem:[#allocation5 + $0x708] sm:$0xff]  ;;  %v596_v1 = vld [vmem:[#allocation5 + $0xf90] sm:$0xff]  ;;  %s1947_s25 = sshll.u32 %s2166_s5, 4  ;;  %s1949_s28 = sshll.u32 %s2329_s6, 4  ;;  %s1948_s25 = int_to_ptr.vmem [resolvable:$true] %s1947_s25  ;;  %s1950_s28 = int_to_ptr.hbm [resolvable:$true] %s1949_s28 }
  0x1a   :  { %v578_v5 = vld [vmem:[#allocation5 + $0xf00] sm:$0xff]  ;;  %v579_v7 = vld [vmem:[#allocation5 + $0xf08] sm:$0xff]  ;;  %647 = vmatpush.msra.mxu0 %v322_v4  ;;  %687 = vmatpush.msra.mxu2 %v323_v6  ;;  %v341_v2 = vld [vmem:[#allocation5 + $0x798] sm:$0xff] }
  0x1b   :  { %v306_v8 = vld [vmem:[#allocation5 + $0x680] sm:$0xff]  ;;  %667 = vmatpush.msra.mxu1 %v578_v5  ;;  %v307_v10 = vld [vmem:[#allocation5 + $0x688] sm:$0xff]  ;;  %707 = vmatpush.msra.mxu3 %v579_v7  ;;  %v597_v3 = vld [vmem:[#allocation5 + $0xf98] sm:$0xff] }
  0x1c   :  { %v562_v9 = vld [vmem:[#allocation5 + $0xe80] sm:$0xff]  ;;  %v563_v11 = vld [vmem:[#allocation5 + $0xe88] sm:$0xff]  ;;  %648 = vmatpush.msra.mxu0 %v306_v8  ;;  %688 = vmatpush.msra.mxu2 %v307_v10  ;;  %v324_v4 = vld [vmem:[#allocation5 + $0x710] sm:$0xff] }
  0x1d   :  { %v290_v12 = vld [vmem:[#allocation5 + $0x600] sm:$0xff]  ;;  %668 = vmatpush.msra.mxu1 %v562_v9  ;;  %v291_v14 = vld [vmem:[#allocation5 + $0x608] sm:$0xff]  ;;  %708 = vmatpush.msra.mxu3 %v563_v11  ;;  %v580_v5 = vld [vmem:[#allocation5 + $0xf10] sm:$0xff] }
  0x1e   :  { %v546_v13 = vld [vmem:[#allocation5 + $0xe00] sm:$0xff]  ;;  %v547_v15 = vld [vmem:[#allocation5 + $0xe08] sm:$0xff]  ;;  %649 = vmatpush.msra.mxu0 %v290_v12  ;;  %689 = vmatpush.msra.mxu2 %v291_v14  ;;  %v325_v6 = vld [vmem:[#allocation5 + $0x718] sm:$0xff] }
  0x1f   :  { %v274_v16 = vld [vmem:[#allocation5 + $0x580] sm:$0xff]  ;;  %669 = vmatpush.msra.mxu1 %v546_v13  ;;  %v275_v18 = vld [vmem:[#allocation5 + $0x588] sm:$0xff]  ;;  %709 = vmatpush.msra.mxu3 %v547_v15  ;;  %v581_v7 = vld [vmem:[#allocation5 + $0xf18] sm:$0xff] }
  0x20   :  { %v530_v17 = vld [vmem:[#allocation5 + $0xd80] sm:$0xff]  ;;  %v531_v19 = vld [vmem:[#allocation5 + $0xd88] sm:$0xff]  ;;  %650 = vmatpush.msra.mxu0 %v274_v16  ;;  %690 = vmatpush.msra.mxu2 %v275_v18  ;;  %v308_v8 = vld [vmem:[#allocation5 + $0x690] sm:$0xff] }
  0x21   :  { %v258_v20 = vld [vmem:[#allocation5 + $0x500] sm:$0xff]  ;;  %670 = vmatpush.msra.mxu1 %v530_v17  ;;  %v259_v22 = vld [vmem:[#allocation5 + $0x508] sm:$0xff]  ;;  %710 = vmatpush.msra.mxu3 %v531_v19  ;;  %v564_v9 = vld [vmem:[#allocation5 + $0xe90] sm:$0xff] }
  0x22   :  { %v514_v21 = vld [vmem:[#allocation5 + $0xd00] sm:$0xff]  ;;  %v515_v23 = vld [vmem:[#allocation5 + $0xd08] sm:$0xff]  ;;  %651 = vmatpush.msra.mxu0 %v258_v20  ;;  %691 = vmatpush.msra.mxu2 %v259_v22  ;;  %v309_v10 = vld [vmem:[#allocation5 + $0x698] sm:$0xff] }
  0x23   :  { %v242_v24 = vld [vmem:[#allocation5 + $0x480] sm:$0xff]  ;;  %671 = vmatpush.msra.mxu1 %v514_v21  ;;  %v243_v26 = vld [vmem:[#allocation5 + $0x488] sm:$0xff]  ;;  %711 = vmatpush.msra.mxu3 %v515_v23  ;;  %v565_v11 = vld [vmem:[#allocation5 + $0xe98] sm:$0xff] }
  0x24   :  { %v498_v25 = vld [vmem:[#allocation5 + $0xc80] sm:$0xff]  ;;  %v499_v27 = vld [vmem:[#allocation5 + $0xc88] sm:$0xff]  ;;  %652 = vmatpush.msra.mxu0 %v242_v24  ;;  %692 = vmatpush.msra.mxu2 %v243_v26  ;;  %v292_v12 = vld [vmem:[#allocation5 + $0x610] sm:$0xff] }
  0x25   :  { %v226_v28 = vld [vmem:[#allocation5 + $0x400] sm:$0xff]  ;;  %672 = vmatpush.msra.mxu1 %v498_v25  ;;  %v227_v30 = vld [vmem:[#allocation5 + $0x408] sm:$0xff]  ;;  %712 = vmatpush.msra.mxu3 %v499_v27  ;;  %v548_v13 = vld [vmem:[#allocation5 + $0xe10] sm:$0xff] }
  0x26   :  { %v482_v29 = vld [vmem:[#allocation5 + $0xc00] sm:$0xff]  ;;  %v483_v31 = vld [vmem:[#allocation5 + $0xc08] sm:$0xff]  ;;  %653 = vmatpush.msra.mxu0 %v226_v28  ;;  %693 = vmatpush.msra.mxu2 %v227_v30  ;;  %v293_v14 = vld [vmem:[#allocation5 + $0x618] sm:$0xff] }
  0x27   :  { %v210_v32 = vld [vmem:[#allocation5 + $0x380] sm:$0xff]  ;;  %673 = vmatpush.msra.mxu1 %v482_v29  ;;  %v211_v34 = vld [vmem:[#allocation5 + $0x388] sm:$0xff]  ;;  %713 = vmatpush.msra.mxu3 %v483_v31  ;;  %v549_v15 = vld [vmem:[#allocation5 + $0xe18] sm:$0xff] }
  0x28   :  { %v466_v33 = vld [vmem:[#allocation5 + $0xb80] sm:$0xff]  ;;  %v467_v35 = vld [vmem:[#allocation5 + $0xb88] sm:$0xff]  ;;  %654 = vmatpush.msra.mxu0 %v210_v32  ;;  %694 = vmatpush.msra.mxu2 %v211_v34  ;;  %v276_v16 = vld [vmem:[#allocation5 + $0x590] sm:$0xff] }
  0x29   :  { %v194_v36 = vld [vmem:[#allocation5 + $0x300] sm:$0xff]  ;;  %674 = vmatpush.msra.mxu1 %v466_v33  ;;  %v195_v38 = vld [vmem:[#allocation5 + $0x308] sm:$0xff]  ;;  %714 = vmatpush.msra.mxu3 %v467_v35  ;;  %v532_v17 = vld [vmem:[#allocation5 + $0xd90] sm:$0xff] }
  0x2a   :  { %v450_v37 = vld [vmem:[#allocation5 + $0xb00] sm:$0xff]  ;;  %v451_v39 = vld [vmem:[#allocation5 + $0xb08] sm:$0xff]  ;;  %655 = vmatpush.msra.mxu0 %v194_v36  ;;  %695 = vmatpush.msra.mxu2 %v195_v38  ;;  %v277_v18 = vld [vmem:[#allocation5 + $0x598] sm:$0xff] }
  0x2b   :  { %v178_v40 = vld [vmem:[#allocation5 + $0x280] sm:$0xff]  ;;  %675 = vmatpush.msra.mxu1 %v450_v37  ;;  %v179_v42 = vld [vmem:[#allocation5 + $0x288] sm:$0xff]  ;;  %715 = vmatpush.msra.mxu3 %v451_v39  ;;  %v533_v19 = vld [vmem:[#allocation5 + $0xd98] sm:$0xff] }
  0x2c   :  { %v434_v41 = vld [vmem:[#allocation5 + $0xa80] sm:$0xff]  ;;  %v435_v43 = vld [vmem:[#allocation5 + $0xa88] sm:$0xff]  ;;  %656 = vmatpush.msra.mxu0 %v178_v40  ;;  %696 = vmatpush.msra.mxu2 %v179_v42  ;;  %v260_v20 = vld [vmem:[#allocation5 + $0x510] sm:$0xff] }
  0x2d   :  { %v162_v44 = vld [vmem:[#allocation5 + $0x200] sm:$0xff]  ;;  %676 = vmatpush.msra.mxu1 %v434_v41  ;;  %v163_v46 = vld [vmem:[#allocation5 + $0x208] sm:$0xff]  ;;  %716 = vmatpush.msra.mxu3 %v435_v43  ;;  %v516_v21 = vld [vmem:[#allocation5 + $0xd10] sm:$0xff] }
  0x2e   :  { %v418_v45 = vld [vmem:[#allocation5 + $0xa00] sm:$0xff]  ;;  %v419_v47 = vld [vmem:[#allocation5 + $0xa08] sm:$0xff]  ;;  %657 = vmatpush.msra.mxu0 %v162_v44  ;;  %697 = vmatpush.msra.mxu2 %v163_v46  ;;  %v261_v22 = vld [vmem:[#allocation5 + $0x518] sm:$0xff] }
  0x2f   :  { %v146_v48 = vld [vmem:[#allocation5 + $0x180] sm:$0xff]  ;;  %677 = vmatpush.msra.mxu1 %v418_v45  ;;  %v147_v50 = vld [vmem:[#allocation5 + $0x188] sm:$0xff]  ;;  %717 = vmatpush.msra.mxu3 %v419_v47  ;;  %v517_v23 = vld [vmem:[#allocation5 + $0xd18] sm:$0xff] }
  0x30   :  { %v402_v49 = vld [vmem:[#allocation5 + $0x980] sm:$0xff]  ;;  %v403_v51 = vld [vmem:[#allocation5 + $0x988] sm:$0xff]  ;;  %658 = vmatpush.msra.mxu0 %v146_v48  ;;  %698 = vmatpush.msra.mxu2 %v147_v50  ;;  %v244_v24 = vld [vmem:[#allocation5 + $0x490] sm:$0xff] }
  0x31   :  { %v130_v52 = vld [vmem:[#allocation5 + $0x100] sm:$0xff]  ;;  %678 = vmatpush.msra.mxu1 %v402_v49  ;;  %v131_v54 = vld [vmem:[#allocation5 + $0x108] sm:$0xff]  ;;  %718 = vmatpush.msra.mxu3 %v403_v51  ;;  %v500_v25 = vld [vmem:[#allocation5 + $0xc90] sm:$0xff] }
  0x32   :  { %v386_v53 = vld [vmem:[#allocation5 + $0x900] sm:$0xff]  ;;  %v387_v55 = vld [vmem:[#allocation5 + $0x908] sm:$0xff]  ;;  %659 = vmatpush.msra.mxu0 %v130_v52  ;;  %699 = vmatpush.msra.mxu2 %v131_v54  ;;  %v245_v26 = vld [vmem:[#allocation5 + $0x498] sm:$0xff] }
  0x33   :  { %v114_v56 = vld [vmem:[#allocation5 + $0x80] sm:$0xff]  ;;  %679 = vmatpush.msra.mxu1 %v386_v53  ;;  %v115_v58 = vld [vmem:[#allocation5 + $0x88] sm:$0xff]  ;;  %719 = vmatpush.msra.mxu3 %v387_v55  ;;  %v501_v27 = vld [vmem:[#allocation5 + $0xc98] sm:$0xff] }
  0x34   :  { %v370_v57 = vld [vmem:[#allocation5 + $0x880] sm:$0xff]  ;;  %v371_v59 = vld [vmem:[#allocation5 + $0x888] sm:$0xff]  ;;  %660 = vmatpush.msra.mxu0 %v114_v56  ;;  %700 = vmatpush.msra.mxu2 %v115_v58  ;;  %v228_v28 = vld [vmem:[#allocation5 + $0x410] sm:$0xff] }
  0x35   :  { %v98_v60 = vld [vmem:[#allocation5] sm:$0xff]  ;;  %680 = vmatpush.msra.mxu1 %v370_v57  ;;  %v99_v62 = vld [vmem:[#allocation5 + $0x8] sm:$0xff]  ;;  %720 = vmatpush.msra.mxu3 %v371_v59  ;;  %v484_v29 = vld [vmem:[#allocation5 + $0xc10] sm:$0xff] }
  0x36   :  { %v354_v61 = vld [vmem:[#allocation5 + $0x800] sm:$0xff]  ;;  %v355_v63 = vld [vmem:[#allocation5 + $0x808] sm:$0xff]  ;;  %661 = vmatpush.msra.mxu0 %v98_v60  ;;  %701 = vmatpush.msra.mxu2 %v99_v62  ;;  %v229_v30 = vld [vmem:[#allocation5 + $0x418] sm:$0xff] }
  0x37   :  { %681 = vmatpush.msra.mxu1 %v354_v61  ;;  %721 = vmatpush.msra.mxu3 %v355_v63  ;;  %v485_v31 = vld [vmem:[#allocation5 + $0xc18] sm:$0xff]  ;;  %v212_v32 = vld [vmem:[#allocation5 + $0x390] sm:$0xff] }
  0x38   :  { %726 = vmatpush.msrb.mxu0 %v340_v0  ;;  %766 = vmatpush.msrb.mxu2 %v341_v2  ;;  %v468_v33 = vld [vmem:[#allocation5 + $0xb90] sm:$0xff]  ;;  %v213_v34 = vld [vmem:[#allocation5 + $0x398] sm:$0xff]  ;;  %v342_v2 = vld [vmem:[#allocation5 + $0x7a0] sm:$0xff] }
  0x39   :  { %746 = vmatpush.msrb.mxu1 %v596_v1  ;;  %786 = vmatpush.msrb.mxu3 %v597_v3  ;;  %v469_v35 = vld [vmem:[#allocation5 + $0xb98] sm:$0xff]  ;;  %v196_v36 = vld [vmem:[#allocation5 + $0x310] sm:$0xff]  ;;  %v598_v3 = vld [vmem:[#allocation5 + $0xfa0] sm:$0xff] }
  0x3a   :  { %727 = vmatpush.msrb.mxu0 %v324_v4  ;;  %767 = vmatpush.msrb.mxu2 %v325_v6  ;;  %v452_v37 = vld [vmem:[#allocation5 + $0xb10] sm:$0xff]  ;;  %v197_v38 = vld [vmem:[#allocation5 + $0x318] sm:$0xff]  ;;  %v343_v4 = vld [vmem:[#allocation5 + $0x7a8] sm:$0xff] }
  0x3b   :  { %747 = vmatpush.msrb.mxu1 %v580_v5  ;;  %787 = vmatpush.msrb.mxu3 %v581_v7  ;;  %v453_v39 = vld [vmem:[#allocation5 + $0xb18] sm:$0xff]  ;;  %v180_v40 = vld [vmem:[#allocation5 + $0x290] sm:$0xff]  ;;  %v599_v5 = vld [vmem:[#allocation5 + $0xfa8] sm:$0xff] }
  0x3c   :  { %728 = vmatpush.msrb.mxu0 %v308_v8  ;;  %768 = vmatpush.msrb.mxu2 %v309_v10  ;;  %v436_v41 = vld [vmem:[#allocation5 + $0xa90] sm:$0xff]  ;;  %v181_v42 = vld [vmem:[#allocation5 + $0x298] sm:$0xff]  ;;  %v326_v6 = vld [vmem:[#allocation5 + $0x720] sm:$0xff] }
  0x3d   :  { %748 = vmatpush.msrb.mxu1 %v564_v9  ;;  %788 = vmatpush.msrb.mxu3 %v565_v11  ;;  %v437_v43 = vld [vmem:[#allocation5 + $0xa98] sm:$0xff]  ;;  %v164_v44 = vld [vmem:[#allocation5 + $0x210] sm:$0xff]  ;;  %v582_v7 = vld [vmem:[#allocation5 + $0xf20] sm:$0xff] }
  0x3e   :  { %729 = vmatpush.msrb.mxu0 %v292_v12  ;;  %769 = vmatpush.msrb.mxu2 %v293_v14  ;;  %v420_v45 = vld [vmem:[#allocation5 + $0xa10] sm:$0xff]  ;;  %v165_v46 = vld [vmem:[#allocation5 + $0x218] sm:$0xff]  ;;  %v327_v8 = vld [vmem:[#allocation5 + $0x728] sm:$0xff] }
  0x3f   :  { %749 = vmatpush.msrb.mxu1 %v548_v13  ;;  %789 = vmatpush.msrb.mxu3 %v549_v15  ;;  %v421_v47 = vld [vmem:[#allocation5 + $0xa18] sm:$0xff]  ;;  %v148_v48 = vld [vmem:[#allocation5 + $0x190] sm:$0xff]  ;;  %v583_v9 = vld [vmem:[#allocation5 + $0xf28] sm:$0xff] }
  0x40   :  { %730 = vmatpush.msrb.mxu0 %v276_v16  ;;  %770 = vmatpush.msrb.mxu2 %v277_v18  ;;  %v404_v49 = vld [vmem:[#allocation5 + $0x990] sm:$0xff]  ;;  %v149_v50 = vld [vmem:[#allocation5 + $0x198] sm:$0xff]  ;;  %v310_v10 = vld [vmem:[#allocation5 + $0x6a0] sm:$0xff] }
  0x41   :  { %750 = vmatpush.msrb.mxu1 %v532_v17  ;;  %790 = vmatpush.msrb.mxu3 %v533_v19  ;;  %v405_v51 = vld [vmem:[#allocation5 + $0x998] sm:$0xff]  ;;  %v132_v52 = vld [vmem:[#allocation5 + $0x110] sm:$0xff]  ;;  %v566_v11 = vld [vmem:[#allocation5 + $0xea0] sm:$0xff] }
  0x42   :  { %731 = vmatpush.msrb.mxu0 %v260_v20  ;;  %771 = vmatpush.msrb.mxu2 %v261_v22  ;;  %v388_v53 = vld [vmem:[#allocation5 + $0x910] sm:$0xff]  ;;  %v133_v54 = vld [vmem:[#allocation5 + $0x118] sm:$0xff]  ;;  %v311_v12 = vld [vmem:[#allocation5 + $0x6a8] sm:$0xff] }
  0x43   :  { %751 = vmatpush.msrb.mxu1 %v516_v21  ;;  %791 = vmatpush.msrb.mxu3 %v517_v23  ;;  %v389_v55 = vld [vmem:[#allocation5 + $0x918] sm:$0xff]  ;;  %v116_v56 = vld [vmem:[#allocation5 + $0x90] sm:$0xff]  ;;  %v567_v13 = vld [vmem:[#allocation5 + $0xea8] sm:$0xff] }
  0x44   :  { %732 = vmatpush.msrb.mxu0 %v244_v24  ;;  %772 = vmatpush.msrb.mxu2 %v245_v26  ;;  %v372_v57 = vld [vmem:[#allocation5 + $0x890] sm:$0xff]  ;;  %v117_v58 = vld [vmem:[#allocation5 + $0x98] sm:$0xff]  ;;  %v294_v14 = vld [vmem:[#allocation5 + $0x620] sm:$0xff] }
  0x45   :  { %752 = vmatpush.msrb.mxu1 %v500_v25  ;;  %792 = vmatpush.msrb.mxu3 %v501_v27  ;;  %v373_v59 = vld [vmem:[#allocation5 + $0x898] sm:$0xff]  ;;  %v2217_v60 = vld [vmem:[#allocation2] sm:$0xff]  ;;  %v550_v15 = vld [vmem:[#allocation5 + $0xe20] sm:$0xff] }
  0x46   :  { %733 = vmatpush.msrb.mxu0 %v228_v28  ;;  %773 = vmatpush.msrb.mxu2 %v229_v30  ;;  %v100_v61 = vld [vmem:[#allocation5 + $0x10] sm:$0xff]  ;;  %v101_v63 = vld [vmem:[#allocation5 + $0x18] sm:$0xff]  ;;  %v295_v16 = vld [vmem:[#allocation5 + $0x628] sm:$0xff] }
  0x47   :  { %753 = vmatpush.msrb.mxu1 %v484_v29  ;;  %793 = vmatpush.msrb.mxu3 %v485_v31  ;;  %v356_v62 = vld [vmem:[#allocation5 + $0x810] sm:$0xff]  ;;  %v357_v0 = vld [vmem:[#allocation5 + $0x818] sm:$0xff]  ;;  %v551_v17 = vld [vmem:[#allocation5 + $0xe28] sm:$0xff] }
  0x48   :  { %734 = vmatpush.msrb.mxu0 %v212_v32  ;;  %774 = vmatpush.msrb.mxu2 %v213_v34  ;;  %v2220_v1 = vld [vmem:[#allocation2 + $0x8] sm:$0xff]  ;;  %v278_v18 = vld [vmem:[#allocation5 + $0x5a0] sm:$0xff]  ;;  %v279_v20 = vld [vmem:[#allocation5 + $0x5a8] sm:$0xff] }
  0x49   :  { %754 = vmatpush.msrb.mxu1 %v468_v33  ;;  %794 = vmatpush.msrb.mxu3 %v469_v35  ;;  %v534_v19 = vld [vmem:[#allocation5 + $0xda0] sm:$0xff]  ;;  %v535_v21 = vld [vmem:[#allocation5 + $0xda8] sm:$0xff] }
  0x4a   :  { %735 = vmatpush.msrb.mxu0 %v196_v36  ;;  %775 = vmatpush.msrb.mxu2 %v197_v38  ;;  %v262_v22 = vld [vmem:[#allocation5 + $0x520] sm:$0xff]  ;;  %v263_v24 = vld [vmem:[#allocation5 + $0x528] sm:$0xff] }
  0x4b   :  { %755 = vmatpush.msrb.mxu1 %v452_v37  ;;  %795 = vmatpush.msrb.mxu3 %v453_v39  ;;  %v518_v23 = vld [vmem:[#allocation5 + $0xd20] sm:$0xff]  ;;  %v519_v25 = vld [vmem:[#allocation5 + $0xd28] sm:$0xff] }
  0x4c   :  { %736 = vmatpush.msrb.mxu0 %v180_v40  ;;  %776 = vmatpush.msrb.mxu2 %v181_v42  ;;  %v246_v26 = vld [vmem:[#allocation5 + $0x4a0] sm:$0xff]  ;;  %v247_v28 = vld [vmem:[#allocation5 + $0x4a8] sm:$0xff] }
  0x4d   :  { %756 = vmatpush.msrb.mxu1 %v436_v41  ;;  %796 = vmatpush.msrb.mxu3 %v437_v43  ;;  %v502_v27 = vld [vmem:[#allocation5 + $0xca0] sm:$0xff]  ;;  %v503_v29 = vld [vmem:[#allocation5 + $0xca8] sm:$0xff] }
  0x4e   :  { %737 = vmatpush.msrb.mxu0 %v164_v44  ;;  %777 = vmatpush.msrb.mxu2 %v165_v46  ;;  %v230_v30 = vld [vmem:[#allocation5 + $0x420] sm:$0xff]  ;;  %v231_v32 = vld [vmem:[#allocation5 + $0x428] sm:$0xff] }
  0x4f   :  { %757 = vmatpush.msrb.mxu1 %v420_v45  ;;  %797 = vmatpush.msrb.mxu3 %v421_v47  ;;  %v486_v31 = vld [vmem:[#allocation5 + $0xc20] sm:$0xff]  ;;  %v487_v33 = vld [vmem:[#allocation5 + $0xc28] sm:$0xff] }
  0x50   :  { %738 = vmatpush.msrb.mxu0 %v148_v48  ;;  %778 = vmatpush.msrb.mxu2 %v149_v50  ;;  %v214_v34 = vld [vmem:[#allocation5 + $0x3a0] sm:$0xff]  ;;  %v215_v36 = vld [vmem:[#allocation5 + $0x3a8] sm:$0xff] }
  0x51   :  { %758 = vmatpush.msrb.mxu1 %v404_v49  ;;  %798 = vmatpush.msrb.mxu3 %v405_v51  ;;  %v470_v35 = vld [vmem:[#allocation5 + $0xba0] sm:$0xff]  ;;  %v471_v37 = vld [vmem:[#allocation5 + $0xba8] sm:$0xff] }
  0x52   :  { %739 = vmatpush.msrb.mxu0 %v132_v52  ;;  %779 = vmatpush.msrb.mxu2 %v133_v54  ;;  %v198_v38 = vld [vmem:[#allocation5 + $0x320] sm:$0xff]  ;;  %v199_v40 = vld [vmem:[#allocation5 + $0x328] sm:$0xff] }
  0x53   :  { %759 = vmatpush.msrb.mxu1 %v388_v53  ;;  %799 = vmatpush.msrb.mxu3 %v389_v55  ;;  %v454_v39 = vld [vmem:[#allocation5 + $0xb20] sm:$0xff]  ;;  %v455_v41 = vld [vmem:[#allocation5 + $0xb28] sm:$0xff] }
  0x54   :  { %740 = vmatpush.msrb.mxu0 %v116_v56  ;;  %780 = vmatpush.msrb.mxu2 %v117_v58  ;;  %v182_v42 = vld [vmem:[#allocation5 + $0x2a0] sm:$0xff]  ;;  %v183_v44 = vld [vmem:[#allocation5 + $0x2a8] sm:$0xff] }
  0x55   :  { %760 = vmatpush.msrb.mxu1 %v372_v57  ;;  %800 = vmatpush.msrb.mxu3 %v373_v59  ;;  %v438_v43 = vld [vmem:[#allocation5 + $0xaa0] sm:$0xff]  ;;  %v439_v45 = vld [vmem:[#allocation5 + $0xaa8] sm:$0xff] }
  0x56   :  { %702 = vmatmul.f32.vlgmr.msra.gmra.mxu2 %v2217_v60  ;;  %741 = vmatpush.msrb.mxu0 %v100_v61  ;;  %v166_v46 = vld [vmem:[#allocation5 + $0x220] sm:$0xff]  ;;  %v167_v48 = vld [vmem:[#allocation5 + $0x228] sm:$0xff] }
  0x57   :  { %761 = vmatpush.msrb.mxu1 %v356_v62  ;;  %781 = vmatpush.msrb.mxu2 %v101_v63  ;;  %v422_v47 = vld [vmem:[#allocation5 + $0xa20] sm:$0xff]  ;;  %v423_v49 = vld [vmem:[#allocation5 + $0xa28] sm:$0xff] }
  0x58   :  { %801 = vmatpush.msrb.mxu3 %v357_v0  ;;  %662 = vmatmul.f32.vlgmr.msra.gmra.mxu0 %v2217_v60  ;;  %v150_v50 = vld [vmem:[#allocation5 + $0x1a0] sm:$0xff]  ;;  %v151_v52 = vld [vmem:[#allocation5 + $0x1a8] sm:$0xff] }
  0x59   :  { %682 = vmatmul.f32.vlgmr.msra.gmra.mxu1 %v2220_v1  ;;  %722 = vmatmul.f32.vlgmr.msra.gmra.mxu3 %v2220_v1  ;;  %v406_v51 = vld [vmem:[#allocation5 + $0x9a0] sm:$0xff]  ;;  %v407_v53 = vld [vmem:[#allocation5 + $0x9a8] sm:$0xff] }
  0x5a   :  { %806 = vmatpush.msra.mxu0 %v342_v2  ;;  %826 = vmatpush.msra.mxu1 %v598_v3  ;;  %v134_v54 = vld [vmem:[#allocation5 + $0x120] sm:$0xff]  ;;  %v135_v56 = vld [vmem:[#allocation5 + $0x128] sm:$0xff] }
  0x5b   :  { %846 = vmatpush.msra.mxu2 %v343_v4  ;;  %866 = vmatpush.msra.mxu3 %v599_v5  ;;  %v390_v55 = vld [vmem:[#allocation5 + $0x920] sm:$0xff]  ;;  %v391_v57 = vld [vmem:[#allocation5 + $0x928] sm:$0xff]  ;;  %v344_v4 = vld [vmem:[#allocation5 + $0x7b0] sm:$0xff] }
  0x5c   :  { %807 = vmatpush.msra.mxu0 %v326_v6  ;;  %827 = vmatpush.msra.mxu1 %v582_v7  ;;  %v118_v58 = vld [vmem:[#allocation5 + $0xa0] sm:$0xff]  ;;  %v119_v61 = vld [vmem:[#allocation5 + $0xa8] sm:$0xff]  ;;  %v600_v5 = vld [vmem:[#allocation5 + $0xfb0] sm:$0xff] }
  0x5d   :  { %847 = vmatpush.msra.mxu2 %v327_v8  ;;  %867 = vmatpush.msra.mxu3 %v583_v9  ;;  %v374_v59 = vld [vmem:[#allocation5 + $0x8a0] sm:$0xff]  ;;  %v375_v62 = vld [vmem:[#allocation5 + $0x8a8] sm:$0xff]  ;;  %v345_v6 = vld [vmem:[#allocation5 + $0x7b8] sm:$0xff] }
  0x5e   :  { %808 = vmatpush.msra.mxu0 %v310_v10  ;;  %828 = vmatpush.msra.mxu1 %v566_v11  ;;  %v102_v63 = vld [vmem:[#allocation5 + $0x20] sm:$0xff]  ;;  %v103_v2 = vld [vmem:[#allocation5 + $0x28] sm:$0xff]  ;;  %v601_v7 = vld [vmem:[#allocation5 + $0xfb8] sm:$0xff] }
  0x5f   :  { %848 = vmatpush.msra.mxu2 %v311_v12  ;;  %868 = vmatpush.msra.mxu3 %v567_v13  ;;  %v358_v0 = vld [vmem:[#allocation5 + $0x820] sm:$0xff]  ;;  %v359_v3 = vld [vmem:[#allocation5 + $0x828] sm:$0xff]  ;;  %v328_v8 = vld [vmem:[#allocation5 + $0x730] sm:$0xff] }
  0x60   :  { %809 = vmatpush.msra.mxu0 %v294_v14  ;;  %829 = vmatpush.msra.mxu1 %v550_v15  ;;  %v584_v9 = vld [vmem:[#allocation5 + $0xf30] sm:$0xff]  ;;  %v329_v10 = vld [vmem:[#allocation5 + $0x738] sm:$0xff] }
  0x61   :  { %849 = vmatpush.msra.mxu2 %v295_v16  ;;  %869 = vmatpush.msra.mxu3 %v551_v17  ;;  %v585_v11 = vld [vmem:[#allocation5 + $0xf38] sm:$0xff]  ;;  %v312_v12 = vld [vmem:[#allocation5 + $0x6b0] sm:$0xff] }
  0x62   :  { %810 = vmatpush.msra.mxu0 %v278_v18  ;;  %830 = vmatpush.msra.mxu1 %v534_v19  ;;  %v568_v13 = vld [vmem:[#allocation5 + $0xeb0] sm:$0xff]  ;;  %v313_v14 = vld [vmem:[#allocation5 + $0x6b8] sm:$0xff] }
  0x63   :  { %850 = vmatpush.msra.mxu2 %v279_v20  ;;  %870 = vmatpush.msra.mxu3 %v535_v21  ;;  %v569_v15 = vld [vmem:[#allocation5 + $0xeb8] sm:$0xff]  ;;  %v296_v16 = vld [vmem:[#allocation5 + $0x630] sm:$0xff] }
  0x64   :  { %811 = vmatpush.msra.mxu0 %v262_v22  ;;  %831 = vmatpush.msra.mxu1 %v518_v23  ;;  %v552_v17 = vld [vmem:[#allocation5 + $0xe30] sm:$0xff]  ;;  %v297_v18 = vld [vmem:[#allocation5 + $0x638] sm:$0xff] }
  0x65   :  { %851 = vmatpush.msra.mxu2 %v263_v24  ;;  %871 = vmatpush.msra.mxu3 %v519_v25  ;;  %v553_v19 = vld [vmem:[#allocation5 + $0xe38] sm:$0xff]  ;;  %v280_v20 = vld [vmem:[#allocation5 + $0x5b0] sm:$0xff] }
  0x66   :  { %812 = vmatpush.msra.mxu0 %v246_v26  ;;  %832 = vmatpush.msra.mxu1 %v502_v27  ;;  %v536_v21 = vld [vmem:[#allocation5 + $0xdb0] sm:$0xff]  ;;  %v281_v22 = vld [vmem:[#allocation5 + $0x5b8] sm:$0xff] }
  0x67   :  { %852 = vmatpush.msra.mxu2 %v247_v28  ;;  %872 = vmatpush.msra.mxu3 %v503_v29  ;;  %v537_v23 = vld [vmem:[#allocation5 + $0xdb8] sm:$0xff]  ;;  %v264_v24 = vld [vmem:[#allocation5 + $0x530] sm:$0xff] }
  0x68   :  { %813 = vmatpush.msra.mxu0 %v230_v30  ;;  %833 = vmatpush.msra.mxu1 %v486_v31  ;;  %v520_v25 = vld [vmem:[#allocation5 + $0xd30] sm:$0xff]  ;;  %v265_v26 = vld [vmem:[#allocation5 + $0x538] sm:$0xff] }
  0x69   :  { %853 = vmatpush.msra.mxu2 %v231_v32  ;;  %873 = vmatpush.msra.mxu3 %v487_v33  ;;  %v521_v27 = vld [vmem:[#allocation5 + $0xd38] sm:$0xff]  ;;  %v248_v28 = vld [vmem:[#allocation5 + $0x4b0] sm:$0xff] }
  0x6a   :  { %814 = vmatpush.msra.mxu0 %v214_v34  ;;  %834 = vmatpush.msra.mxu1 %v470_v35  ;;  %v504_v29 = vld [vmem:[#allocation5 + $0xcb0] sm:$0xff]  ;;  %v249_v30 = vld [vmem:[#allocation5 + $0x4b8] sm:$0xff] }
  0x6b   :  { %854 = vmatpush.msra.mxu2 %v215_v36  ;;  %874 = vmatpush.msra.mxu3 %v471_v37  ;;  %v505_v31 = vld [vmem:[#allocation5 + $0xcb8] sm:$0xff]  ;;  %v232_v32 = vld [vmem:[#allocation5 + $0x430] sm:$0xff] }
  0x6c   :  { %815 = vmatpush.msra.mxu0 %v198_v38  ;;  %835 = vmatpush.msra.mxu1 %v454_v39  ;;  %v488_v33 = vld [vmem:[#allocation5 + $0xc30] sm:$0xff]  ;;  %v233_v34 = vld [vmem:[#allocation5 + $0x438] sm:$0xff] }
  0x6d   :  { %855 = vmatpush.msra.mxu2 %v199_v40  ;;  %875 = vmatpush.msra.mxu3 %v455_v41  ;;  %v489_v35 = vld [vmem:[#allocation5 + $0xc38] sm:$0xff]  ;;  %v216_v36 = vld [vmem:[#allocation5 + $0x3b0] sm:$0xff] }
  0x6e   :  { %816 = vmatpush.msra.mxu0 %v182_v42  ;;  %836 = vmatpush.msra.mxu1 %v438_v43  ;;  %v472_v37 = vld [vmem:[#allocation5 + $0xbb0] sm:$0xff]  ;;  %v217_v38 = vld [vmem:[#allocation5 + $0x3b8] sm:$0xff] }
  0x6f   :  { %856 = vmatpush.msra.mxu2 %v183_v44  ;;  %876 = vmatpush.msra.mxu3 %v439_v45  ;;  %v473_v39 = vld [vmem:[#allocation5 + $0xbb8] sm:$0xff]  ;;  %v200_v40 = vld [vmem:[#allocation5 + $0x330] sm:$0xff] }
  0x70   :  { %817 = vmatpush.msra.mxu0 %v166_v46  ;;  %837 = vmatpush.msra.mxu1 %v422_v47  ;;  %v456_v41 = vld [vmem:[#allocation5 + $0xb30] sm:$0xff]  ;;  %v201_v42 = vld [vmem:[#allocation5 + $0x338] sm:$0xff] }
  0x71   :  { %857 = vmatpush.msra.mxu2 %v167_v48  ;;  %877 = vmatpush.msra.mxu3 %v423_v49  ;;  %v457_v43 = vld [vmem:[#allocation5 + $0xb38] sm:$0xff]  ;;  %v184_v44 = vld [vmem:[#allocation5 + $0x2b0] sm:$0xff] }
  0x72   :  { %818 = vmatpush.msra.mxu0 %v150_v50  ;;  %838 = vmatpush.msra.mxu1 %v406_v51  ;;  %v440_v45 = vld [vmem:[#allocation5 + $0xab0] sm:$0xff]  ;;  %v185_v46 = vld [vmem:[#allocation5 + $0x2b8] sm:$0xff] }
  0x73   :  { %858 = vmatpush.msra.mxu2 %v151_v52  ;;  %878 = vmatpush.msra.mxu3 %v407_v53  ;;  %v441_v47 = vld [vmem:[#allocation5 + $0xab8] sm:$0xff]  ;;  %v168_v48 = vld [vmem:[#allocation5 + $0x230] sm:$0xff] }
  0x74   :  { %819 = vmatpush.msra.mxu0 %v134_v54  ;;  %839 = vmatpush.msra.mxu1 %v390_v55  ;;  %v424_v49 = vld [vmem:[#allocation5 + $0xa30] sm:$0xff]  ;;  %v169_v50 = vld [vmem:[#allocation5 + $0x238] sm:$0xff] }
  0x75   :  { %859 = vmatpush.msra.mxu2 %v135_v56  ;;  %879 = vmatpush.msra.mxu3 %v391_v57  ;;  %v425_v51 = vld [vmem:[#allocation5 + $0xa38] sm:$0xff]  ;;  %v152_v52 = vld [vmem:[#allocation5 + $0x1b0] sm:$0xff] }
  0x76   :  { %820 = vmatpush.msra.mxu0 %v118_v58  ;;  %840 = vmatpush.msra.mxu1 %v374_v59  ;;  %v408_v53 = vld [vmem:[#allocation5 + $0x9b0] sm:$0xff]  ;;  %v153_v54 = vld [vmem:[#allocation5 + $0x1b8] sm:$0xff] }
  0x77   :  { %860 = vmatpush.msra.mxu2 %v119_v61  ;;  %880 = vmatpush.msra.mxu3 %v375_v62  ;;  %v409_v55 = vld [vmem:[#allocation5 + $0x9b8] sm:$0xff]  ;;  %v136_v56 = vld [vmem:[#allocation5 + $0x130] sm:$0xff] }
  0x78   :  { %782 = vmatmul.f32.vlgmr.msrb.gmra.mxu2 %v2217_v60  ;;  %821 = vmatpush.msra.mxu0 %v102_v63  ;;  %v392_v57 = vld [vmem:[#allocation5 + $0x930] sm:$0xff]  ;;  %v137_v58 = vld [vmem:[#allocation5 + $0x138] sm:$0xff] }
  0x79   :  { %841 = vmatpush.msra.mxu1 %v358_v0  ;;  %861 = vmatpush.msra.mxu2 %v103_v2  ;;  %v393_v59 = vld [vmem:[#allocation5 + $0x938] sm:$0xff]  ;;  %v120_v61 = vld [vmem:[#allocation5 + $0xb0] sm:$0xff] }
  0x7a   :  { %881 = vmatpush.msra.mxu3 %v359_v3  ;;  %742 = vmatmul.f32.vlgmr.msrb.gmra.mxu0 %v2217_v60  ;;  %v376_v62 = vld [vmem:[#allocation5 + $0x8b0] sm:$0xff]  ;;  %v121_v63 = vld [vmem:[#allocation5 + $0xb8] sm:$0xff] }
  0x7b   :  { %762 = vmatmul.f32.vlgmr.msrb.gmra.mxu1 %v2220_v1  ;;  %802 = vmatmul.f32.vlgmr.msrb.gmra.mxu3 %v2220_v1  ;;  %v377_v0 = vld [vmem:[#allocation5 + $0x8b8] sm:$0xff]  ;;  %v104_v2 = vld [vmem:[#allocation5 + $0x30] sm:$0xff] }
  0x7c   :  { %886 = vmatpush.msrb.mxu0 %v344_v4  ;;  %906 = vmatpush.msrb.mxu1 %v600_v5  ;;  %v360_v3 = vld [vmem:[#allocation5 + $0x830] sm:$0xff]  ;;  %v105_v4 = vld [vmem:[#allocation5 + $0x38] sm:$0xff] }
  0x7d   :  { %926 = vmatpush.msrb.mxu2 %v345_v6  ;;  %946 = vmatpush.msrb.mxu3 %v601_v7  ;;  %v361_v5 = vld [vmem:[#allocation5 + $0x838] sm:$0xff]  ;;  %v346_v6 = vld [vmem:[#allocation5 + $0x7c0] sm:$0xff] }
  0x7e   :  { %887 = vmatpush.msrb.mxu0 %v328_v8  ;;  %907 = vmatpush.msrb.mxu1 %v584_v9  ;;  %v602_v7 = vld [vmem:[#allocation5 + $0xfc0] sm:$0xff]  ;;  %v347_v8 = vld [vmem:[#allocation5 + $0x7c8] sm:$0xff] }
  0x7f   :  { %927 = vmatpush.msrb.mxu2 %v329_v10  ;;  %947 = vmatpush.msrb.mxu3 %v585_v11  ;;  %v603_v9 = vld [vmem:[#allocation5 + $0xfc8] sm:$0xff]  ;;  %v330_v10 = vld [vmem:[#allocation5 + $0x740] sm:$0xff] }
  0x80   :  { %888 = vmatpush.msrb.mxu0 %v312_v12  ;;  %908 = vmatpush.msrb.mxu1 %v568_v13  ;;  %v586_v11 = vld [vmem:[#allocation5 + $0xf40] sm:$0xff]  ;;  %v331_v12 = vld [vmem:[#allocation5 + $0x748] sm:$0xff] }
  0x81   :  { %928 = vmatpush.msrb.mxu2 %v313_v14  ;;  %948 = vmatpush.msrb.mxu3 %v569_v15  ;;  %v587_v13 = vld [vmem:[#allocation5 + $0xf48] sm:$0xff]  ;;  %v314_v14 = vld [vmem:[#allocation5 + $0x6c0] sm:$0xff] }
  0x82   :  { %889 = vmatpush.msrb.mxu0 %v296_v16  ;;  %909 = vmatpush.msrb.mxu1 %v552_v17  ;;  %v570_v15 = vld [vmem:[#allocation5 + $0xec0] sm:$0xff]  ;;  %v315_v16 = vld [vmem:[#allocation5 + $0x6c8] sm:$0xff] }
  0x83   :  { %929 = vmatpush.msrb.mxu2 %v297_v18  ;;  %949 = vmatpush.msrb.mxu3 %v553_v19  ;;  %v571_v17 = vld [vmem:[#allocation5 + $0xec8] sm:$0xff]  ;;  %v298_v18 = vld [vmem:[#allocation5 + $0x640] sm:$0xff] }
  0x84   :  { %890 = vmatpush.msrb.mxu0 %v280_v20  ;;  %910 = vmatpush.msrb.mxu1 %v536_v21  ;;  %v554_v19 = vld [vmem:[#allocation5 + $0xe40] sm:$0xff]  ;;  %v299_v20 = vld [vmem:[#allocation5 + $0x648] sm:$0xff] }
  0x85   :  { %930 = vmatpush.msrb.mxu2 %v281_v22  ;;  %950 = vmatpush.msrb.mxu3 %v537_v23  ;;  %v555_v21 = vld [vmem:[#allocation5 + $0xe48] sm:$0xff]  ;;  %v282_v22 = vld [vmem:[#allocation5 + $0x5c0] sm:$0xff] }
  0x86   :  { %891 = vmatpush.msrb.mxu0 %v264_v24  ;;  %911 = vmatpush.msrb.mxu1 %v520_v25  ;;  %v538_v23 = vld [vmem:[#allocation5 + $0xdc0] sm:$0xff]  ;;  %v283_v24 = vld [vmem:[#allocation5 + $0x5c8] sm:$0xff] }
  0x87   :  { %931 = vmatpush.msrb.mxu2 %v265_v26  ;;  %951 = vmatpush.msrb.mxu3 %v521_v27  ;;  %v539_v25 = vld [vmem:[#allocation5 + $0xdc8] sm:$0xff]  ;;  %v266_v26 = vld [vmem:[#allocation5 + $0x540] sm:$0xff] }
  0x88   :  { %892 = vmatpush.msrb.mxu0 %v248_v28  ;;  %912 = vmatpush.msrb.mxu1 %v504_v29  ;;  %v522_v27 = vld [vmem:[#allocation5 + $0xd40] sm:$0xff]  ;;  %v267_v28 = vld [vmem:[#allocation5 + $0x548] sm:$0xff] }
  0x89   :  { %932 = vmatpush.msrb.mxu2 %v249_v30  ;;  %952 = vmatpush.msrb.mxu3 %v505_v31  ;;  %v523_v29 = vld [vmem:[#allocation5 + $0xd48] sm:$0xff]  ;;  %v250_v30 = vld [vmem:[#allocation5 + $0x4c0] sm:$0xff] }
  0x8a   :  { %893 = vmatpush.msrb.mxu0 %v232_v32  ;;  %913 = vmatpush.msrb.mxu1 %v488_v33  ;;  %v506_v31 = vld [vmem:[#allocation5 + $0xcc0] sm:$0xff]  ;;  %v251_v32 = vld [vmem:[#allocation5 + $0x4c8] sm:$0xff] }
  0x8b   :  { %933 = vmatpush.msrb.mxu2 %v233_v34  ;;  %953 = vmatpush.msrb.mxu3 %v489_v35  ;;  %v507_v33 = vld [vmem:[#allocation5 + $0xcc8] sm:$0xff]  ;;  %v234_v34 = vld [vmem:[#allocation5 + $0x440] sm:$0xff] }
  0x8c   :  { %894 = vmatpush.msrb.mxu0 %v216_v36  ;;  %914 = vmatpush.msrb.mxu1 %v472_v37  ;;  %v490_v35 = vld [vmem:[#allocation5 + $0xc40] sm:$0xff]  ;;  %v235_v36 = vld [vmem:[#allocation5 + $0x448] sm:$0xff] }
  0x8d   :  { %934 = vmatpush.msrb.mxu2 %v217_v38  ;;  %954 = vmatpush.msrb.mxu3 %v473_v39  ;;  %v491_v37 = vld [vmem:[#allocation5 + $0xc48] sm:$0xff]  ;;  %v218_v38 = vld [vmem:[#allocation5 + $0x3c0] sm:$0xff] }
  0x8e   :  { %895 = vmatpush.msrb.mxu0 %v200_v40  ;;  %915 = vmatpush.msrb.mxu1 %v456_v41  ;;  %v474_v39 = vld [vmem:[#allocation5 + $0xbc0] sm:$0xff]  ;;  %v219_v40 = vld [vmem:[#allocation5 + $0x3c8] sm:$0xff] }
  0x8f   :  { %935 = vmatpush.msrb.mxu2 %v201_v42  ;;  %955 = vmatpush.msrb.mxu3 %v457_v43  ;;  %v475_v41 = vld [vmem:[#allocation5 + $0xbc8] sm:$0xff]  ;;  %v202_v42 = vld [vmem:[#allocation5 + $0x340] sm:$0xff] }
  0x90   :  { %896 = vmatpush.msrb.mxu0 %v184_v44  ;;  %916 = vmatpush.msrb.mxu1 %v440_v45  ;;  %v458_v43 = vld [vmem:[#allocation5 + $0xb40] sm:$0xff]  ;;  %v203_v44 = vld [vmem:[#allocation5 + $0x348] sm:$0xff] }
  0x91   :  { %936 = vmatpush.msrb.mxu2 %v185_v46  ;;  %956 = vmatpush.msrb.mxu3 %v441_v47  ;;  %v459_v45 = vld [vmem:[#allocation5 + $0xb48] sm:$0xff]  ;;  %v186_v46 = vld [vmem:[#allocation5 + $0x2c0] sm:$0xff] }
  0x92   :  { %897 = vmatpush.msrb.mxu0 %v168_v48  ;;  %917 = vmatpush.msrb.mxu1 %v424_v49  ;;  %v442_v47 = vld [vmem:[#allocation5 + $0xac0] sm:$0xff]  ;;  %v187_v48 = vld [vmem:[#allocation5 + $0x2c8] sm:$0xff] }
  0x93   :  { %937 = vmatpush.msrb.mxu2 %v169_v50  ;;  %957 = vmatpush.msrb.mxu3 %v425_v51  ;;  %v443_v49 = vld [vmem:[#allocation5 + $0xac8] sm:$0xff]  ;;  %v170_v50 = vld [vmem:[#allocation5 + $0x240] sm:$0xff] }
  0x94   :  { %898 = vmatpush.msrb.mxu0 %v152_v52  ;;  %918 = vmatpush.msrb.mxu1 %v408_v53  ;;  %v426_v51 = vld [vmem:[#allocation5 + $0xa40] sm:$0xff]  ;;  %v171_v52 = vld [vmem:[#allocation5 + $0x248] sm:$0xff] }
  0x95   :  { %938 = vmatpush.msrb.mxu2 %v153_v54  ;;  %958 = vmatpush.msrb.mxu3 %v409_v55  ;;  %v427_v53 = vld [vmem:[#allocation5 + $0xa48] sm:$0xff]  ;;  %v154_v54 = vld [vmem:[#allocation5 + $0x1c0] sm:$0xff] }
  0x96   :  { %899 = vmatpush.msrb.mxu0 %v136_v56  ;;  %919 = vmatpush.msrb.mxu1 %v392_v57  ;;  %v410_v55 = vld [vmem:[#allocation5 + $0x9c0] sm:$0xff]  ;;  %v155_v56 = vld [vmem:[#allocation5 + $0x1c8] sm:$0xff] }
  0x97   :  { %939 = vmatpush.msrb.mxu2 %v137_v58  ;;  %959 = vmatpush.msrb.mxu3 %v393_v59  ;;  %v411_v57 = vld [vmem:[#allocation5 + $0x9c8] sm:$0xff]  ;;  %v138_v58 = vld [vmem:[#allocation5 + $0x140] sm:$0xff] }
  0x98   :  { %900 = vmatpush.msrb.mxu0 %v120_v61  ;;  %920 = vmatpush.msrb.mxu1 %v376_v62  ;;  %v394_v59 = vld [vmem:[#allocation5 + $0x940] sm:$0xff]  ;;  %v139_v61 = vld [vmem:[#allocation5 + $0x148] sm:$0xff] }
  0x99   :  { %940 = vmatpush.msrb.mxu2 %v121_v63  ;;  %960 = vmatpush.msrb.mxu3 %v377_v0  ;;  %v395_v62 = vld [vmem:[#allocation5 + $0x948] sm:$0xff]  ;;  %v122_v63 = vld [vmem:[#allocation5 + $0xc0] sm:$0xff] }
  0x9a   :  { %862 = vmatmul.f32.vlgmr.msra.gmra.mxu2 %v2217_v60  ;;  %901 = vmatpush.msrb.mxu0 %v104_v2  ;;  %v378_v0 = vld [vmem:[#allocation5 + $0x8c0] sm:$0xff]  ;;  %v123_v2 = vld [vmem:[#allocation5 + $0xc8] sm:$0xff] }
  0x9b   :  { %921 = vmatpush.msrb.mxu1 %v360_v3  ;;  %941 = vmatpush.msrb.mxu2 %v105_v4  ;;  %v379_v3 = vld [vmem:[#allocation5 + $0x8c8] sm:$0xff]  ;;  %v106_v4 = vld [vmem:[#allocation5 + $0x40] sm:$0xff] }
  0x9c   :  { %961 = vmatpush.msrb.mxu3 %v361_v5  ;;  %822 = vmatmul.f32.vlgmr.msra.gmra.mxu0 %v2217_v60  ;;  %v362_v5 = vld [vmem:[#allocation5 + $0x840] sm:$0xff] }
  0x9d   :  { %842 = vmatmul.f32.vlgmr.msra.gmra.mxu1 %v2220_v1  ;;  %882 = vmatmul.f32.vlgmr.msra.gmra.mxu3 %v2220_v1 }
  0x9e   :  { %966 = vmatpush.msra.mxu0 %v346_v6  ;;  %986 = vmatpush.msra.mxu1 %v602_v7  ;;  %v107_v6 = vld [vmem:[#allocation5 + $0x48] sm:$0xff] }
  0x9f   :  { %1006 = vmatpush.msra.mxu2 %v347_v8  ;;  %1026 = vmatpush.msra.mxu3 %v603_v9  ;;  %v363_v7 = vld [vmem:[#allocation5 + $0x848] sm:$0xff]  ;;  %v348_v8 = vld [vmem:[#allocation5 + $0x7d0] sm:$0xff] }
  0xa0   :  { %967 = vmatpush.msra.mxu0 %v330_v10  ;;  %987 = vmatpush.msra.mxu1 %v586_v11  ;;  %v604_v9 = vld [vmem:[#allocation5 + $0xfd0] sm:$0xff]  ;;  %v349_v10 = vld [vmem:[#allocation5 + $0x7d8] sm:$0xff] }
  0xa1   :  { %1007 = vmatpush.msra.mxu2 %v331_v12  ;;  %1027 = vmatpush.msra.mxu3 %v587_v13  ;;  %v605_v11 = vld [vmem:[#allocation5 + $0xfd8] sm:$0xff]  ;;  %v332_v12 = vld [vmem:[#allocation5 + $0x750] sm:$0xff] }
  0xa2   :  { %968 = vmatpush.msra.mxu0 %v314_v14  ;;  %988 = vmatpush.msra.mxu1 %v570_v15  ;;  %v588_v13 = vld [vmem:[#allocation5 + $0xf50] sm:$0xff]  ;;  %v333_v14 = vld [vmem:[#allocation5 + $0x758] sm:$0xff] }
  0xa3   :  { %1008 = vmatpush.msra.mxu2 %v315_v16  ;;  %1028 = vmatpush.msra.mxu3 %v571_v17  ;;  %v589_v15 = vld [vmem:[#allocation5 + $0xf58] sm:$0xff]  ;;  %v316_v16 = vld [vmem:[#allocation5 + $0x6d0] sm:$0xff] }
  0xa4   :  { %969 = vmatpush.msra.mxu0 %v298_v18  ;;  %989 = vmatpush.msra.mxu1 %v554_v19  ;;  %v572_v17 = vld [vmem:[#allocation5 + $0xed0] sm:$0xff]  ;;  %v317_v18 = vld [vmem:[#allocation5 + $0x6d8] sm:$0xff] }
  0xa5   :  { %1009 = vmatpush.msra.mxu2 %v299_v20  ;;  %1029 = vmatpush.msra.mxu3 %v555_v21  ;;  %v300_v19 = vld [vmem:[#allocation5 + $0x650] sm:$0xff]  ;;  %v557_v21 = vld [vmem:[#allocation5 + $0xe58] sm:$0xff] }
  0xa6   :  { %970 = vmatpush.msra.mxu0 %v282_v22  ;;  %990 = vmatpush.msra.mxu1 %v538_v23  ;;  %v556_v20 = vld [vmem:[#allocation5 + $0xe50] sm:$0xff] }
  0xa7   :  { %1010 = vmatpush.msra.mxu2 %v283_v24  ;;  %1030 = vmatpush.msra.mxu3 %v539_v25  ;;  %v284_v22 = vld [vmem:[#allocation5 + $0x5d0] sm:$0xff]  ;;  %v285_v24 = vld [vmem:[#allocation5 + $0x5d8] sm:$0xff] }
  0xa8   :  { %971 = vmatpush.msra.mxu0 %v266_v26  ;;  %991 = vmatpush.msra.mxu1 %v522_v27  ;;  %v540_v23 = vld [vmem:[#allocation5 + $0xdd0] sm:$0xff]  ;;  %v541_v25 = vld [vmem:[#allocation5 + $0xdd8] sm:$0xff] }
  0xa9   :  { %1011 = vmatpush.msra.mxu2 %v267_v28  ;;  %1031 = vmatpush.msra.mxu3 %v523_v29  ;;  %v268_v26 = vld [vmem:[#allocation5 + $0x550] sm:$0xff]  ;;  %v269_v28 = vld [vmem:[#allocation5 + $0x558] sm:$0xff] }
  0xaa   :  { %972 = vmatpush.msra.mxu0 %v250_v30  ;;  %992 = vmatpush.msra.mxu1 %v506_v31  ;;  %v524_v27 = vld [vmem:[#allocation5 + $0xd50] sm:$0xff]  ;;  %v525_v29 = vld [vmem:[#allocation5 + $0xd58] sm:$0xff] }
  0xab   :  { %1012 = vmatpush.msra.mxu2 %v251_v32  ;;  %1032 = vmatpush.msra.mxu3 %v507_v33  ;;  %v252_v30 = vld [vmem:[#allocation5 + $0x4d0] sm:$0xff]  ;;  %v253_v32 = vld [vmem:[#allocation5 + $0x4d8] sm:$0xff] }
  0xac   :  { %973 = vmatpush.msra.mxu0 %v234_v34  ;;  %993 = vmatpush.msra.mxu1 %v490_v35  ;;  %v508_v31 = vld [vmem:[#allocation5 + $0xcd0] sm:$0xff]  ;;  %v509_v33 = vld [vmem:[#allocation5 + $0xcd8] sm:$0xff] }
  0xad   :  { %1013 = vmatpush.msra.mxu2 %v235_v36  ;;  %1033 = vmatpush.msra.mxu3 %v491_v37  ;;  %v236_v34 = vld [vmem:[#allocation5 + $0x450] sm:$0xff]  ;;  %v237_v36 = vld [vmem:[#allocation5 + $0x458] sm:$0xff] }
  0xae   :  { %974 = vmatpush.msra.mxu0 %v218_v38  ;;  %994 = vmatpush.msra.mxu1 %v474_v39  ;;  %v492_v35 = vld [vmem:[#allocation5 + $0xc50] sm:$0xff]  ;;  %v493_v37 = vld [vmem:[#allocation5 + $0xc58] sm:$0xff] }
  0xaf   :  { %1014 = vmatpush.msra.mxu2 %v219_v40  ;;  %1034 = vmatpush.msra.mxu3 %v475_v41  ;;  %v220_v38 = vld [vmem:[#allocation5 + $0x3d0] sm:$0xff]  ;;  %v221_v40 = vld [vmem:[#allocation5 + $0x3d8] sm:$0xff] }
  0xb0   :  { %975 = vmatpush.msra.mxu0 %v202_v42  ;;  %995 = vmatpush.msra.mxu1 %v458_v43  ;;  %v476_v39 = vld [vmem:[#allocation5 + $0xbd0] sm:$0xff]  ;;  %v477_v41 = vld [vmem:[#allocation5 + $0xbd8] sm:$0xff] }
  0xb1   :  { %1015 = vmatpush.msra.mxu2 %v203_v44  ;;  %1035 = vmatpush.msra.mxu3 %v459_v45  ;;  %v204_v42 = vld [vmem:[#allocation5 + $0x350] sm:$0xff]  ;;  %v2237_v44 = vld [vmem:[#allocation7] sm:$0xff]  ;;  %v205_v45 = vld [vmem:[#allocation5 + $0x358] sm:$0xff] }
  0xb2   :  { %976 = vmatpush.msra.mxu0 %v186_v46  ;;  %996 = vmatpush.msra.mxu1 %v442_v47  ;;  %v460_v43 = vld [vmem:[#allocation5 + $0xb50] sm:$0xff]  ;;  %v461_v46 = vld [vmem:[#allocation5 + $0xb58] sm:$0xff] }
  0xb3   :  { %1016 = vmatpush.msra.mxu2 %v187_v48  ;;  %1036 = vmatpush.msra.mxu3 %v443_v49  ;;  %v188_v47 = vld [vmem:[#allocation5 + $0x2d0] sm:$0xff]  ;;  %v189_v49 = vld [vmem:[#allocation5 + $0x2d8] sm:$0xff] }
  0xb4   :  { %977 = vmatpush.msra.mxu0 %v170_v50  ;;  %997 = vmatpush.msra.mxu1 %v426_v51  ;;  %v444_v48 = vld [vmem:[#allocation5 + $0xad0] sm:$0xff]  ;;  %v445_v50 = vld [vmem:[#allocation5 + $0xad8] sm:$0xff]  ;;  %v614_v51 = vperm.slane %v2237_v44, 0 }
  0xb5   :  { %1017 = vmatpush.msra.mxu2 %v171_v52  ;;  %1037 = vmatpush.msra.mxu3 %v427_v53  ;;  %v172_v52 = vld [vmem:[#allocation5 + $0x250] sm:$0xff] }
  0xb6   :  { %978 = vmatpush.msra.mxu0 %v154_v54  ;;  %998 = vmatpush.msra.mxu1 %v410_v55  ;;  %v428_v53 = vld [vmem:[#allocation5 + $0xa50] sm:$0xff]  ;;  %v173_v54 = vld [vmem:[#allocation5 + $0x258] sm:$0xff] }
  0xb7   :  { %1018 = vmatpush.msra.mxu2 %v155_v56  ;;  %1038 = vmatpush.msra.mxu3 %v411_v57  ;;  %v429_v55 = vld [vmem:[#allocation5 + $0xa58] sm:$0xff]  ;;  %v156_v56 = vld [vmem:[#allocation5 + $0x1d0] sm:$0xff] }
  0xb8   :  { %979 = vmatpush.msra.mxu0 %v138_v58  ;;  %999 = vmatpush.msra.mxu1 %v394_v59  ;;  %v412_v57 = vld [vmem:[#allocation5 + $0x9d0] sm:$0xff]  ;;  %v157_v59 = vld [vmem:[#allocation5 + $0x1d8] sm:$0xff] }
  0xb9   :  { %1019 = vmatpush.msra.mxu2 %v139_v61  ;;  %1039 = vmatpush.msra.mxu3 %v395_v62  ;;  %v413_v61 = vld [vmem:[#allocation5 + $0x9d8] sm:$0xff] }
  0xba   :  { %980 = vmatpush.msra.mxu0 %v122_v63  ;;  %1000 = vmatpush.msra.mxu1 %v378_v0  ;;  %v615_v0 = vperm.slane %v2237_v44, 1 }
  0xbb   :  { %1020 = vmatpush.msra.mxu2 %v123_v2  ;;  %1040 = vmatpush.msra.mxu3 %v379_v3  ;;  %v140_v2 = vld [vmem:[#allocation5 + $0x150] sm:$0xff] }
  0xbc   :  { %942 = vmatmul.f32.vlgmr.msrb.gmra.mxu2 %v2217_v60  ;;  %981 = vmatpush.msra.mxu0 %v106_v4  ;;  %v396_v3 = vld [vmem:[#allocation5 + $0x950] sm:$0xff]  ;;  %v141_v4 = vld [vmem:[#allocation5 + $0x158] sm:$0xff] }
  0xbd   :  { %1001 = vmatpush.msra.mxu1 %v362_v5  ;;  %1021 = vmatpush.msra.mxu2 %v107_v6  ;;  %v397_v5 = vld [vmem:[#allocation5 + $0x958] sm:$0xff] }
  0xbe   :  { %1041 = vmatpush.msra.mxu3 %v363_v7  ;;  %902 = vmatmul.f32.vlgmr.msrb.gmra.mxu0 %v2217_v60  ;;  %v573_v60 = vld [vmem:[#allocation5 + $0xed8] sm:$0xff]  ;;  %v124_v7 = vld [vmem:[#allocation5 + $0xd0] sm:$0xff] }
  0xbf   :  { %922 = vmatmul.f32.vlgmr.msrb.gmra.mxu1 %v2220_v1  ;;  %962 = vmatmul.f32.vlgmr.msrb.gmra.mxu3 %v2220_v1  ;;  %v301_v1 = vld [vmem:[#allocation5 + $0x658] sm:$0xff] }
  0xc0   :  { %1046 = vmatpush.msrb.mxu0 %v348_v8  ;;  %1066 = vmatpush.msrb.mxu1 %v604_v9  ;;  %v380_v8 = vld [vmem:[#allocation5 + $0x8d0] sm:$0xff] }
  0xc1   :  { %1086 = vmatpush.msrb.mxu2 %v349_v10  ;;  %1106 = vmatpush.msrb.mxu3 %v605_v11  ;;  %v125_v10 = vld [vmem:[#allocation5 + $0xd8] sm:$0xff] }
  0xc2   :  { %1047 = vmatpush.msrb.mxu0 %v332_v12  ;;  %1067 = vmatpush.msrb.mxu1 %v588_v13  ;;  %v381_v11 = vld [vmem:[#allocation5 + $0x8d8] sm:$0xff] }
  0xc3   :  { %1087 = vmatpush.msrb.mxu2 %v333_v14  ;;  %1107 = vmatpush.msrb.mxu3 %v589_v15  ;;  %v108_v14 = vld [vmem:[#allocation5 + $0x50] sm:$0xff] }
  0xc4   :  { %1048 = vmatpush.msrb.mxu0 %v316_v16  ;;  %1068 = vmatpush.msrb.mxu1 %v572_v17  ;;  %v364_v15 = vld [vmem:[#allocation5 + $0x850] sm:$0xff]  ;;  %v109_v16 = vld [vmem:[#allocation5 + $0x58] sm:$0xff] }
  0xc5   :  { %1088 = vmatpush.msrb.mxu2 %v317_v18  ;;  %1108 = vmatpush.msrb.mxu3 %v573_v60  ;;  %v365_v60 = vld [vmem:[#allocation5 + $0x858] sm:$0xff] }
  0xc6   :  { %1049 = vmatpush.msrb.mxu0 %v300_v19  ;;  %1069 = vmatpush.msrb.mxu1 %v556_v20  ;;  %v2244_v20 = vld [vmem:[#allocation2] sm:$0xff] }
  0xc7   :  { %1089 = vmatpush.msrb.mxu2 %v301_v1  ;;  %1109 = vmatpush.msrb.mxu3 %v557_v21  ;;  %v350_v1 = vld [vmem:[#allocation5 + $0x7e0] sm:$0xff] }
  0xc8   :  { %1050 = vmatpush.msrb.mxu0 %v284_v22  ;;  %1070 = vmatpush.msrb.mxu1 %v540_v23  ;;  %v606_v21 = vld [vmem:[#allocation5 + $0xfe0] sm:$0xff]  ;;  %v351_v23 = vld [vmem:[#allocation5 + $0x7e8] sm:$0xff] }
  0xc9   :  { %1090 = vmatpush.msrb.mxu2 %v285_v24  ;;  %1110 = vmatpush.msrb.mxu3 %v541_v25  ;;  %v607_v24 = vld [vmem:[#allocation5 + $0xfe8] sm:$0xff]  ;;  %v2248_v25 = vld [vmem:[#allocation2 + $0x8] sm:$0xff] }
  0xca   :  { %1051 = vmatpush.msrb.mxu0 %v268_v26  ;;  %1071 = vmatpush.msrb.mxu1 %v524_v27  ;;  %v334_v26 = vld [vmem:[#allocation5 + $0x760] sm:$0xff] }
  0xcb   :  { %1091 = vmatpush.msrb.mxu2 %v269_v28  ;;  %1111 = vmatpush.msrb.mxu3 %v525_v29  ;;  %v590_v27 = vld [vmem:[#allocation5 + $0xf60] sm:$0xff]  ;;  %v335_v29 = vld [vmem:[#allocation5 + $0x768] sm:$0xff] }
  0xcc   :  { %1052 = vmatpush.msrb.mxu0 %v252_v30  ;;  %1072 = vmatpush.msrb.mxu1 %v508_v31  ;;  %v591_v30 = vld [vmem:[#allocation5 + $0xf68] sm:$0xff]  ;;  %v318_v31 = vld [vmem:[#allocation5 + $0x6e0] sm:$0xff] }
  0xcd   :  { %1092 = vmatpush.msrb.mxu2 %v253_v32  ;;  %1112 = vmatpush.msrb.mxu3 %v509_v33  ;;  %v574_v32 = vld [vmem:[#allocation5 + $0xee0] sm:$0xff]  ;;  %v319_v33 = vld [vmem:[#allocation5 + $0x6e8] sm:$0xff] }
  0xce   :  { %1053 = vmatpush.msrb.mxu0 %v236_v34  ;;  %1073 = vmatpush.msrb.mxu1 %v492_v35  ;;  %v575_v34 = vld [vmem:[#allocation5 + $0xee8] sm:$0xff]  ;;  %v302_v35 = vld [vmem:[#allocation5 + $0x660] sm:$0xff] }
  0xcf   :  { %1093 = vmatpush.msrb.mxu2 %v237_v36  ;;  %1113 = vmatpush.msrb.mxu3 %v493_v37  ;;  %v558_v36 = vld [vmem:[#allocation5 + $0xe60] sm:$0xff]  ;;  %v303_v37 = vld [vmem:[#allocation5 + $0x668] sm:$0xff] }
  0xd0   :  { %1054 = vmatpush.msrb.mxu0 %v220_v38  ;;  %1074 = vmatpush.msrb.mxu1 %v476_v39  ;;  %v559_v38 = vld [vmem:[#allocation5 + $0xe68] sm:$0xff]  ;;  %v286_v39 = vld [vmem:[#allocation5 + $0x5e0] sm:$0xff] }
  0xd1   :  { %1094 = vmatpush.msrb.mxu2 %v221_v40  ;;  %1114 = vmatpush.msrb.mxu3 %v477_v41  ;;  %v542_v40 = vld [vmem:[#allocation5 + $0xde0] sm:$0xff]  ;;  %v287_v41 = vld [vmem:[#allocation5 + $0x5e8] sm:$0xff] }
  0xd2   :  { %1055 = vmatpush.msrb.mxu0 %v204_v42  ;;  %1075 = vmatpush.msrb.mxu1 %v460_v43  ;;  %v543_v42 = vld [vmem:[#allocation5 + $0xde8] sm:$0xff]  ;;  %v270_v43 = vld [vmem:[#allocation5 + $0x560] sm:$0xff] }
  0xd3   :  { %1095 = vmatpush.msrb.mxu2 %v205_v45  ;;  %1115 = vmatpush.msrb.mxu3 %v461_v46  ;;  %v526_v45 = vld [vmem:[#allocation5 + $0xd60] sm:$0xff]  ;;  %v271_v46 = vld [vmem:[#allocation5 + $0x568] sm:$0xff] }
  0xd4   :  { %1056 = vmatpush.msrb.mxu0 %v188_v47  ;;  %1076 = vmatpush.msrb.mxu1 %v444_v48  ;;  %v527_v47 = vld [vmem:[#allocation5 + $0xd68] sm:$0xff]  ;;  %v254_v48 = vld [vmem:[#allocation5 + $0x4e0] sm:$0xff] }
  0xd5   :  { %1096 = vmatpush.msrb.mxu2 %v189_v49  ;;  %1116 = vmatpush.msrb.mxu3 %v445_v50  ;;  %v663_v58 = vpop.f32.mrf.mxu0  ;;  %v510_v49 = vld [vmem:[#allocation5 + $0xce0] sm:$0xff]  ;;  %v255_v50 = vld [vmem:[#allocation5 + $0x4e8] sm:$0xff] }
  0xd6   :  { %1057 = vmatpush.msrb.mxu0 %v172_v52  ;;  %1077 = vmatpush.msrb.mxu1 %v428_v53  ;;  %v664_v62 = vadd.f32 %v663_v58, %v614_v51  ;;  %v683_v63 = vpop.f32.mrf.mxu1  ;;  %v511_v51 = vld [vmem:[#allocation5 + $0xce8] sm:$0xff]  ;;  %v238_v52 = vld [vmem:[#allocation5 + $0x460] sm:$0xff] }
  0xd7   :  { %1097 = vmatpush.msrb.mxu2 %v173_v54  ;;  %1117 = vmatpush.msrb.mxu3 %v429_v55  ;;  %v494_v53 = vld [vmem:[#allocation5 + $0xc60] sm:$0xff]  ;;  %v239_v54 = vld [vmem:[#allocation5 + $0x468] sm:$0xff] }
  0xd8   :  { %1058 = vmatpush.msrb.mxu0 %v156_v56  ;;  %1078 = vmatpush.msrb.mxu1 %v412_v57  ;;  %v684_v6 = vadd.f32 %v683_v63, %v664_v62  ;;  %v495_v55 = vld [vmem:[#allocation5 + $0xc68] sm:$0xff]  ;;  %v222_v56 = vld [vmem:[#allocation5 + $0x3e0] sm:$0xff] }
  0xd9   :  { %1098 = vmatpush.msrb.mxu2 %v157_v59  ;;  %1118 = vmatpush.msrb.mxu3 %v413_v61  ;;  %v703_v9 = vpop.f32.mrf.mxu2  ;;  %v478_v57 = vld [vmem:[#allocation5 + $0xbe0] sm:$0xff]  ;;  %v223_v58 = vld [vmem:[#allocation5 + $0x3e8] sm:$0xff] }
  0xda   :  { %1059 = vmatpush.msrb.mxu0 %v140_v2  ;;  %1079 = vmatpush.msrb.mxu1 %v396_v3  ;;  %vm1286_vm0 = vcmp.gt.f32.partialorder %v684_v6, 0.0  ;;  %v1302_v12 = vmul.f32 0.2, %v684_v6  ;;  %v704_v13 = vadd.f32 %v703_v9, %v615_v0  ;;  %v479_v59 = vld [vmem:[#allocation5 + $0xbe8] sm:$0xff]  ;;  %v206_v61 = vld [vmem:[#allocation5 + $0x360] sm:$0xff] }
  0xdb   :  { %1099 = vmatpush.msrb.mxu2 %v141_v4  ;;  %1119 = vmatpush.msrb.mxu3 %v397_v5  ;;  %v462_v62 = vld [vmem:[#allocation5 + $0xb60] sm:$0xff]  ;;  %v207_v63 = vld [vmem:[#allocation5 + $0x368] sm:$0xff]  ;;  %v616_v4 = vperm.slane %v2237_v44, 2 }
  0xdc   :  { %1060 = vmatpush.msrb.mxu0 %v124_v7  ;;  %1080 = vmatpush.msrb.mxu1 %v380_v8  ;;  %v723_v17 = vpop.f32.mrf.mxu3  ;;  %v2241_v18 = vsel %vm1286_vm0, %v684_v6, %v1302_v12  ;;  %v463_v0 = vld [vmem:[#allocation5 + $0xb68] sm:$0xff]  ;;  %v190_v2 = vld [vmem:[#allocation5 + $0x2e0] sm:$0xff] }
  0xdd   :  { %1100 = vmatpush.msrb.mxu2 %v125_v10  ;;  %1120 = vmatpush.msrb.mxu3 %v381_v11  ;;  %v724_v19 = vadd.f32 %v723_v17, %v704_v13  ;;  %1334 = vst [vmem:[#allocation11] sm:$0xff] %v2241_v18  ;;  %v446_v3 = vld [vmem:[#allocation5 + $0xae0] sm:$0xff]  ;;  %v191_v5 = vld [vmem:[#allocation5 + $0x2e8] sm:$0xff] }
  0xde   :  { %1022 = vmatmul.f32.vlgmr.msra.gmra.mxu2 %v2244_v20  ;;  %1061 = vmatpush.msrb.mxu0 %v108_v14  ;;  %v447_v6 = vld [vmem:[#allocation5 + $0xae8] sm:$0xff]  ;;  %v430_v7 = vld [vmem:[#allocation5 + $0xa60] sm:$0xff]  ;;  %v617_v14 = vperm.slane %v2237_v44, 3 }
  0xdf   :  { %1081 = vmatpush.msrb.mxu1 %v364_v15  ;;  %1101 = vmatpush.msrb.mxu2 %v109_v16  ;;  %vm1287_vm1 = vcmp.gt.f32.partialorder %v724_v19, 0.0  ;;  %v1303_v22 = vmul.f32 0.2, %v724_v19  ;;  %v174_v8 = vld [vmem:[#allocation5 + $0x260] sm:$0xff]  ;;  %v175_v9 = vld [vmem:[#allocation5 + $0x268] sm:$0xff] }
  0xe0   :  { %1121 = vmatpush.msrb.mxu3 %v365_v60  ;;  %982 = vmatmul.f32.vlgmr.msra.gmra.mxu0 %v2244_v20  ;;  %v431_v11 = vld [vmem:[#allocation5 + $0xa68] sm:$0xff]  ;;  %v158_v15 = vld [vmem:[#allocation5 + $0x1e0] sm:$0xff] }
  0xe1   :  { %1002 = vmatmul.f32.vlgmr.msra.gmra.mxu1 %v2248_v25  ;;  %1042 = vmatmul.f32.vlgmr.msra.gmra.mxu3 %v2248_v25  ;;  %v2252_v28 = vsel %vm1287_vm1, %v724_v19, %v1303_v22  ;;  %v414_v16 = vld [vmem:[#allocation5 + $0x9e0] sm:$0xff]  ;;  %v159_v17 = vld [vmem:[#allocation5 + $0x1e8] sm:$0xff] }
  0xe2   :  { %1126 = vmatpush.msra.mxu0 %v350_v1  ;;  %1146 = vmatpush.msra.mxu1 %v606_v21  ;;  %1335 = vst [vmem:[#allocation11 + $0x8] sm:$0xff] %v2252_v28  ;;  %v415_v60 = vld [vmem:[#allocation5 + $0x9e8] sm:$0xff]  ;;  %v142_v1 = vld [vmem:[#allocation5 + $0x160] sm:$0xff] }
  0xe3   :  { %1166 = vmatpush.msra.mxu2 %v351_v23  ;;  %1186 = vmatpush.msra.mxu3 %v607_v24  ;;  %v398_v21 = vld [vmem:[#allocation5 + $0x960] sm:$0xff]  ;;  %v143_v23 = vld [vmem:[#allocation5 + $0x168] sm:$0xff] }
  0xe4   :  { %1127 = vmatpush.msra.mxu0 %v334_v26  ;;  %1147 = vmatpush.msra.mxu1 %v590_v27  ;;  %v399_v24 = vld [vmem:[#allocation5 + $0x968] sm:$0xff] }
  0xe5   :  { %1167 = vmatpush.msra.mxu2 %v335_v29  ;;  %1187 = vmatpush.msra.mxu3 %v591_v30  ;;  %v126_v29 = vld [vmem:[#allocation5 + $0xe0] sm:$0xff] }
  0xe6   :  { %1128 = vmatpush.msra.mxu0 %v318_v31  ;;  %1148 = vmatpush.msra.mxu1 %v574_v32  ;;  %v382_v30 = vld [vmem:[#allocation5 + $0x8e0] sm:$0xff]  ;;  %v127_v31 = vld [vmem:[#allocation5 + $0xe8] sm:$0xff] }
  0xe7   :  { %1168 = vmatpush.msra.mxu2 %v319_v33  ;;  %1188 = vmatpush.msra.mxu3 %v575_v34  ;;  %v383_v32 = vld [vmem:[#allocation5 + $0x8e8] sm:$0xff] }
  0xe8   :  { %1129 = vmatpush.msra.mxu0 %v302_v35  ;;  %1149 = vmatpush.msra.mxu1 %v558_v36  ;;  %v110_v35 = vld [vmem:[#allocation5 + $0x60] sm:$0xff] }
  0xe9   :  { %1169 = vmatpush.msra.mxu2 %v303_v37  ;;  %1189 = vmatpush.msra.mxu3 %v559_v38  ;;  %v366_v36 = vld [vmem:[#allocation5 + $0x860] sm:$0xff]  ;;  %v111_v38 = vld [vmem:[#allocation5 + $0x68] sm:$0xff] }
  0xea   :  { %1130 = vmatpush.msra.mxu0 %v286_v39  ;;  %1150 = vmatpush.msra.mxu1 %v542_v40  ;;  %v367_v39 = vld [vmem:[#allocation5 + $0x868] sm:$0xff]  ;;  %v352_v40 = vld [vmem:[#allocation5 + $0x7f0] sm:$0xff] }
  0xeb   :  { %1170 = vmatpush.msra.mxu2 %v287_v41  ;;  %1190 = vmatpush.msra.mxu3 %v543_v42  ;;  %v608_v41 = vld [vmem:[#allocation5 + $0xff0] sm:$0xff] }
  0xec   :  { %1131 = vmatpush.msra.mxu0 %v270_v43  ;;  %1151 = vmatpush.msra.mxu1 %v526_v45  ;;  %v353_v43 = vld [vmem:[#allocation5 + $0x7f8] sm:$0xff] }
  0xed   :  { %1171 = vmatpush.msra.mxu2 %v271_v46  ;;  %1191 = vmatpush.msra.mxu3 %v527_v47  ;;  %v609_v45 = vld [vmem:[#allocation5 + $0xff8] sm:$0xff]  ;;  %v336_v46 = vld [vmem:[#allocation5 + $0x770] sm:$0xff] }
  0xee   :  { %1132 = vmatpush.msra.mxu0 %v254_v48  ;;  %1152 = vmatpush.msra.mxu1 %v510_v49  ;;  %v592_v47 = vld [vmem:[#allocation5 + $0xf70] sm:$0xff]  ;;  %v337_v49 = vld [vmem:[#allocation5 + $0x778] sm:$0xff] }
  0xef   :  { %1172 = vmatpush.msra.mxu2 %v255_v50  ;;  %1192 = vmatpush.msra.mxu3 %v511_v51  ;;  %v593_v50 = vld [vmem:[#allocation5 + $0xf78] sm:$0xff]  ;;  %v320_v51 = vld [vmem:[#allocation5 + $0x6f0] sm:$0xff] }
  0xf0   :  { %1133 = vmatpush.msra.mxu0 %v238_v52  ;;  %1153 = vmatpush.msra.mxu1 %v494_v53  ;;  %v576_v52 = vld [vmem:[#allocation5 + $0xef0] sm:$0xff]  ;;  %v321_v53 = vld [vmem:[#allocation5 + $0x6f8] sm:$0xff] }
  0xf1   :  { %1173 = vmatpush.msra.mxu2 %v239_v54  ;;  %1193 = vmatpush.msra.mxu3 %v495_v55  ;;  %v577_v54 = vld [vmem:[#allocation5 + $0xef8] sm:$0xff]  ;;  %v304_v55 = vld [vmem:[#allocation5 + $0x670] sm:$0xff] }
  0xf2   :  { %1134 = vmatpush.msra.mxu0 %v222_v56  ;;  %1154 = vmatpush.msra.mxu1 %v478_v57  ;;  %v560_v56 = vld [vmem:[#allocation5 + $0xe70] sm:$0xff]  ;;  %v305_v57 = vld [vmem:[#allocation5 + $0x678] sm:$0xff] }
  0xf3   :  { %1174 = vmatpush.msra.mxu2 %v223_v58  ;;  %1194 = vmatpush.msra.mxu3 %v479_v59  ;;  %v561_v58 = vld [vmem:[#allocation5 + $0xe78] sm:$0xff]  ;;  %v288_v59 = vld [vmem:[#allocation5 + $0x5f0] sm:$0xff] }
  0xf4   :  { %1102 = vmatmul.f32.vlgmr.msrb.gmra.mxu2 %v2244_v20  ;;  %1135 = vmatpush.msra.mxu0 %v206_v61  ;;  %v544_v61 = vld [vmem:[#allocation5 + $0xdf0] sm:$0xff] }
  0xf5   :  { %1155 = vmatpush.msra.mxu1 %v462_v62  ;;  %1175 = vmatpush.msra.mxu2 %v207_v63  ;;  %v289_v62 = vld [vmem:[#allocation5 + $0x5f8] sm:$0xff] }
  0xf6   :  { %1195 = vmatpush.msra.mxu3 %v463_v0  ;;  %1136 = vmatpush.msra.mxu0 %v190_v2  ;;  %v545_v63 = vld [vmem:[#allocation5 + $0xdf8] sm:$0xff]  ;;  %v272_v0 = vld [vmem:[#allocation5 + $0x570] sm:$0xff] }
  0xf7   :  { %1122 = vmatmul.f32.vlgmr.msrb.gmra.mxu3 %v2248_v25  ;;  %1156 = vmatpush.msra.mxu1 %v446_v3  ;;  %v743_v10 = vpop.f32.mrf.mxu0  ;;  %v528_v2 = vld [vmem:[#allocation5 + $0xd70] sm:$0xff]  ;;  %v273_v3 = vld [vmem:[#allocation5 + $0x578] sm:$0xff] }
  0xf8   :  { %1176 = vmatpush.msra.mxu2 %v191_v5  ;;  %1196 = vmatpush.msra.mxu3 %v447_v6  ;;  %v744_v12 = vadd.f32 %v743_v10, %v616_v4  ;;  %v763_v13 = vpop.f32.mrf.mxu1  ;;  %v529_v4 = vld [vmem:[#allocation5 + $0xd78] sm:$0xff]  ;;  %v256_v5 = vld [vmem:[#allocation5 + $0x4f0] sm:$0xff] }
  0xf9   :  { %1062 = vmatmul.f32.vlgmr.msrb.gmra.mxu0 %v2244_v20  ;;  %1157 = vmatpush.msra.mxu1 %v430_v7  ;;  %v512_v6 = vld [vmem:[#allocation5 + $0xcf0] sm:$0xff]  ;;  %v257_v7 = vld [vmem:[#allocation5 + $0x4f8] sm:$0xff] }
  0xfa   :  { %1137 = vmatpush.msra.mxu0 %v174_v8  ;;  %1177 = vmatpush.msra.mxu2 %v175_v9  ;;  %v764_v19 = vadd.f32 %v763_v13, %v744_v12  ;;  %v513_v8 = vld [vmem:[#allocation5 + $0xcf8] sm:$0xff]  ;;  %v240_v9 = vld [vmem:[#allocation5 + $0x470] sm:$0xff] }
  0xfb   :  { %1197 = vmatpush.msra.mxu3 %v431_v11  ;;  %1082 = vmatmul.f32.vlgmr.msrb.gmra.mxu1 %v2248_v25  ;;  %v783_v22 = vpop.f32.mrf.mxu2  ;;  %v496_v10 = vld [vmem:[#allocation5 + $0xc70] sm:$0xff]  ;;  %v241_v11 = vld [vmem:[#allocation5 + $0x478] sm:$0xff] }
  0xfc   :  { %1138 = vmatpush.msra.mxu0 %v158_v15  ;;  %1158 = vmatpush.msra.mxu1 %v414_v16  ;;  %vm1288_vm2 = vcmp.gt.f32.partialorder %v764_v19, 0.0  ;;  %v1304_v26 = vmul.f32 0.2, %v764_v19  ;;  %v784_v27 = vadd.f32 %v783_v22, %v617_v14  ;;  %v497_v12 = vld [vmem:[#allocation5 + $0xc78] sm:$0xff]  ;;  %v224_v13 = vld [vmem:[#allocation5 + $0x3f0] sm:$0xff] }
  0xfd   :  { %1178 = vmatpush.msra.mxu2 %v159_v17  ;;  %1198 = vmatpush.msra.mxu3 %v415_v60  ;;  %v480_v14 = vld [vmem:[#allocation5 + $0xbf0] sm:$0xff]  ;;  %v225_v15 = vld [vmem:[#allocation5 + $0x3f8] sm:$0xff] }
  0xfe   :  { %1139 = vmatpush.msra.mxu0 %v142_v1  ;;  %1159 = vmatpush.msra.mxu1 %v398_v21  ;;  %v803_v33 = vpop.f32.mrf.mxu3  ;;  %v2261_v34 = vsel %vm1288_vm2, %v764_v19, %v1304_v26  ;;  %v481_v16 = vld [vmem:[#allocation5 + $0xbf8] sm:$0xff]  ;;  %v208_v17 = vld [vmem:[#allocation5 + $0x370] sm:$0xff] }
  0xff   :  { %1179 = vmatpush.msra.mxu2 %v143_v23  ;;  %1199 = vmatpush.msra.mxu3 %v399_v24  ;;  %v804_v37 = vadd.f32 %v803_v33, %v784_v27  ;;  %1336 = vst [vmem:[#allocation11 + $0x10] sm:$0xff] %v2261_v34  ;;  %v464_v60 = vld [vmem:[#allocation5 + $0xb70] sm:$0xff]  ;;  %v209_v19 = vld [vmem:[#allocation5 + $0x378] sm:$0xff]  ;;  %v618_v23 = vperm.slane %v2237_v44, 4 }
 0x100   :  { %1140 = vmatpush.msra.mxu0 %v126_v29  ;;  %1160 = vmatpush.msra.mxu1 %v382_v30  ;;  %v465_v1 = vld [vmem:[#allocation5 + $0xb78] sm:$0xff]  ;;  %v192_v21 = vld [vmem:[#allocation5 + $0x2f0] sm:$0xff] }
 0x101   :  { %1180 = vmatpush.msra.mxu2 %v127_v31  ;;  %1200 = vmatpush.msra.mxu3 %v383_v32  ;;  %vm1289_vm3 = vcmp.gt.f32.partialorder %v804_v37, 0.0  ;;  %v1305_v42 = vmul.f32 0.2, %v804_v37  ;;  %v448_v22 = vld [vmem:[#allocation5 + $0xaf0] sm:$0xff]  ;;  %v193_v24 = vld [vmem:[#allocation5 + $0x2f8] sm:$0xff] }
 0x102   :  { %1141 = vmatpush.msra.mxu0 %v110_v35  ;;  %1161 = vmatpush.msra.mxu1 %v366_v36  ;;  %v449_v26 = vld [vmem:[#allocation5 + $0xaf8] sm:$0xff]  ;;  %v432_v27 = vld [vmem:[#allocation5 + $0xa70] sm:$0xff]  ;;  %v619_v36 = vperm.slane %v2237_v44, 5 }
 0x103   :  { %1181 = vmatpush.msra.mxu2 %v111_v38  ;;  %1201 = vmatpush.msra.mxu3 %v367_v39  ;;  %v2264_v48 = vsel %vm1289_vm3, %v804_v37, %v1305_v42  ;;  %v176_v29 = vld [vmem:[#allocation5 + $0x270] sm:$0xff]  ;;  %v177_v30 = vld [vmem:[#allocation5 + $0x278] sm:$0xff] }
 0x104   :  { %1206 = vmatpush.msrb.mxu0 %v352_v40  ;;  %1226 = vmatpush.msrb.mxu1 %v608_v41  ;;  %1337 = vst [vmem:[#allocation11 + $0x18] sm:$0xff] %v2264_v48  ;;  %v433_v32 = vld [vmem:[#allocation5 + $0xa78] sm:$0xff]  ;;  %v160_v37 = vld [vmem:[#allocation5 + $0x1f0] sm:$0xff] }
 0x105   :  { %1246 = vmatpush.msrb.mxu2 %v353_v43  ;;  %1266 = vmatpush.msrb.mxu3 %v609_v45  ;;  %v416_v38 = vld [vmem:[#allocation5 + $0x9f0] sm:$0xff]  ;;  %v161_v39 = vld [vmem:[#allocation5 + $0x1f8] sm:$0xff] }
 0x106   :  { %1207 = vmatpush.msrb.mxu0 %v336_v46  ;;  %1227 = vmatpush.msrb.mxu1 %v592_v47  ;;  %v417_v40 = vld [vmem:[#allocation5 + $0x9f8] sm:$0xff]  ;;  %v144_v42 = vld [vmem:[#allocation5 + $0x170] sm:$0xff] }
 0x107   :  { %1247 = vmatpush.msrb.mxu2 %v337_v49  ;;  %1267 = vmatpush.msrb.mxu3 %v593_v50  ;;  %v400_v43 = vld [vmem:[#allocation5 + $0x970] sm:$0xff]  ;;  %v145_v46 = vld [vmem:[#allocation5 + $0x178] sm:$0xff] }
 0x108   :  { %1208 = vmatpush.msrb.mxu0 %v320_v51  ;;  %1228 = vmatpush.msrb.mxu1 %v576_v52  ;;  %v401_v47 = vld [vmem:[#allocation5 + $0x978] sm:$0xff]  ;;  %v128_v51 = vld [vmem:[#allocation5 + $0xf0] sm:$0xff] }
 0x109   :  { %1248 = vmatpush.msrb.mxu2 %v321_v53  ;;  %1268 = vmatpush.msrb.mxu3 %v577_v54  ;;  %v384_v52 = vld [vmem:[#allocation5 + $0x8f0] sm:$0xff]  ;;  %v129_v53 = vld [vmem:[#allocation5 + $0xf8] sm:$0xff] }
 0x10a   :  { %1209 = vmatpush.msrb.mxu0 %v304_v55  ;;  %1229 = vmatpush.msrb.mxu1 %v560_v56  ;;  %v385_v54 = vld [vmem:[#allocation5 + $0x8f8] sm:$0xff] }
 0x10b   :  { %1249 = vmatpush.msrb.mxu2 %v305_v57  ;;  %1269 = vmatpush.msrb.mxu3 %v561_v58  ;;  %v112_v57 = vld [vmem:[#allocation5 + $0x70] sm:$0xff] }
 0x10c   :  { %1210 = vmatpush.msrb.mxu0 %v288_v59  ;;  %1230 = vmatpush.msrb.mxu1 %v544_v61  ;;  %v368_v58 = vld [vmem:[#allocation5 + $0x870] sm:$0xff]  ;;  %v113_v61 = vld [vmem:[#allocation5 + $0x78] sm:$0xff] }
 0x10d   :  { %1250 = vmatpush.msrb.mxu2 %v289_v62  ;;  %1270 = vmatpush.msrb.mxu3 %v545_v63  ;;  %v369_v62 = vld [vmem:[#allocation5 + $0x878] sm:$0xff] }
 0x10e   :  { %1211 = vmatpush.msrb.mxu0 %v272_v0  ;;  %1231 = vmatpush.msrb.mxu1 %v528_v2  ;;  %v1365_v0 = vld [vmem:[#allocation8 + $0x78] sm:$0xff] }
 0x10f   :  { %1251 = vmatpush.msrb.mxu2 %v273_v3  ;;  %1271 = vmatpush.msrb.mxu3 %v529_v4  ;;  %v1381_v2 = vld [vmem:[#allocation8 + $0xf8] sm:$0xff] }
 0x110   :  { %1212 = vmatpush.msrb.mxu0 %v256_v5  ;;  %1232 = vmatpush.msrb.mxu1 %v512_v6  ;;  %v1397_v3 = vld [vmem:[#allocation8 + $0x178] sm:$0xff]  ;;  %v1364_v6 = vld [vmem:[#allocation8 + $0x70] sm:$0xff] }
 0x111   :  { %1252 = vmatpush.msrb.mxu2 %v257_v7  ;;  %1272 = vmatpush.msrb.mxu3 %v513_v8  ;;  %v1413_v4 = vld [vmem:[#allocation8 + $0x1f8] sm:$0xff]  ;;  %v1380_v7 = vld [vmem:[#allocation8 + $0xf0] sm:$0xff] }
 0x112   :  { %1213 = vmatpush.msrb.mxu0 %v240_v9  ;;  %1233 = vmatpush.msrb.mxu1 %v496_v10  ;;  %v1396_v8 = vld [vmem:[#allocation8 + $0x170] sm:$0xff]  ;;  %v1363_v10 = vld [vmem:[#allocation8 + $0x68] sm:$0xff] }
 0x113   :  { %1253 = vmatpush.msrb.mxu2 %v241_v11  ;;  %1273 = vmatpush.msrb.mxu3 %v497_v12  ;;  %v1412_v9 = vld [vmem:[#allocation8 + $0x1f0] sm:$0xff]  ;;  %v1379_v11 = vld [vmem:[#allocation8 + $0xe8] sm:$0xff] }
 0x114   :  { %1214 = vmatpush.msrb.mxu0 %v224_v13  ;;  %1234 = vmatpush.msrb.mxu1 %v480_v14  ;;  %v1395_v12 = vld [vmem:[#allocation8 + $0x168] sm:$0xff]  ;;  %v1362_v13 = vld [vmem:[#allocation8 + $0x60] sm:$0xff] }
 0x115   :  { %1254 = vmatpush.msrb.mxu2 %v225_v15  ;;  %1274 = vmatpush.msrb.mxu3 %v481_v16  ;;  %v1378_v14 = vld [vmem:[#allocation8 + $0xe0] sm:$0xff] }
 0x116   :  { %1182 = vmatmul.f32.vlgmr.msra.gmra.mxu2 %v2244_v20  ;;  %1215 = vmatpush.msrb.mxu0 %v208_v17  ;;  %v1394_v15 = vld [vmem:[#allocation8 + $0x160] sm:$0xff]  ;;  %v1361_v17 = vld [vmem:[#allocation8 + $0x58] sm:$0xff] }
 0x117   :  { %1235 = vmatpush.msrb.mxu1 %v464_v60  ;;  %1255 = vmatpush.msrb.mxu2 %v209_v19  ;;  %v1410_v16 = vld [vmem:[#allocation8 + $0x1e0] sm:$0xff]  ;;  %v1377_v60 = vld [vmem:[#allocation8 + $0xd8] sm:$0xff] }
 0x118   :  { %1275 = vmatpush.msrb.mxu3 %v465_v1  ;;  %1216 = vmatpush.msrb.mxu0 %v192_v21  ;;  %v1409_v19 = vld [vmem:[#allocation8 + $0x1d8] sm:$0xff]  ;;  %v1360_v1 = vld [vmem:[#allocation8 + $0x50] sm:$0xff] }
 0x119   :  { %1202 = vmatmul.f32.vlgmr.msra.gmra.mxu3 %v2248_v25  ;;  %1236 = vmatpush.msrb.mxu1 %v448_v22  ;;  %v823_v31 = vpop.f32.mrf.mxu0  ;;  %v1376_v21 = vld [vmem:[#allocation8 + $0xd0] sm:$0xff] }
 0x11a   :  { %1256 = vmatpush.msrb.mxu2 %v193_v24  ;;  %1276 = vmatpush.msrb.mxu3 %v449_v26  ;;  %v824_v33 = vadd.f32 %v823_v31, %v618_v23  ;;  %v843_v35 = vpop.f32.mrf.mxu1  ;;  %v1392_v22 = vld [vmem:[#allocation8 + $0x150] sm:$0xff]  ;;  %v1359_v24 = vld [vmem:[#allocation8 + $0x48] sm:$0xff]  ;;  %v1374_v31 = vld [vmem:[#allocation8 + $0xc0] sm:$0xff] }
 0x11b   :  { %1142 = vmatmul.f32.vlgmr.msra.gmra.mxu0 %v2244_v20  ;;  %1237 = vmatpush.msrb.mxu1 %v432_v27  ;;  %v1408_v23 = vld [vmem:[#allocation8 + $0x1d0] sm:$0xff]  ;;  %v1375_v26 = vld [vmem:[#allocation8 + $0xc8] sm:$0xff] }
 0x11c   :  { %1217 = vmatpush.msrb.mxu0 %v176_v29  ;;  %1257 = vmatpush.msrb.mxu2 %v177_v30  ;;  %v844_v41 = vadd.f32 %v843_v35, %v824_v33  ;;  %v1391_v27 = vld [vmem:[#allocation8 + $0x148] sm:$0xff]  ;;  %v1358_v30 = vld [vmem:[#allocation8 + $0x40] sm:$0xff]  ;;  %v1357_v35 = vld [vmem:[#allocation8 + $0x38] sm:$0xff] }
 0x11d   :  { %1277 = vmatpush.msrb.mxu3 %v433_v32  ;;  %1162 = vmatmul.f32.vlgmr.msra.gmra.mxu1 %v2248_v25  ;;  %v863_v45 = vpop.f32.mrf.mxu2  ;;  %v1407_v29 = vld [vmem:[#allocation8 + $0x1c8] sm:$0xff]  ;;  %v1390_v32 = vld [vmem:[#allocation8 + $0x140] sm:$0xff] }
 0x11e   :  { %1218 = vmatpush.msrb.mxu0 %v160_v37  ;;  %1238 = vmatpush.msrb.mxu1 %v416_v38  ;;  %vm1290_vm4 = vcmp.gt.f32.partialorder %v844_v41, 0.0  ;;  %v1306_v49 = vmul.f32 0.2, %v844_v41  ;;  %v864_v50 = vadd.f32 %v863_v45, %v619_v36  ;;  %v1406_v33 = vld [vmem:[#allocation8 + $0x1c0] sm:$0xff]  ;;  %v1373_v36 = vld [vmem:[#allocation8 + $0xb8] sm:$0xff]  ;;  %v1355_v45 = vld [vmem:[#allocation8 + $0x28] sm:$0xff] }
 0x11f   :  { %1258 = vmatpush.msrb.mxu2 %v161_v39  ;;  %1278 = vmatpush.msrb.mxu3 %v417_v40  ;;  %v1389_v37 = vld [vmem:[#allocation8 + $0x138] sm:$0xff]  ;;  %v1356_v39 = vld [vmem:[#allocation8 + $0x30] sm:$0xff] }
 0x120   :  { %1219 = vmatpush.msrb.mxu0 %v144_v42  ;;  %1239 = vmatpush.msrb.mxu1 %v400_v43  ;;  %v883_v55 = vpop.f32.mrf.mxu3  ;;  %v2273_v56 = vsel %vm1290_vm4, %v844_v41, %v1306_v49  ;;  %v1405_v38 = vld [vmem:[#allocation8 + $0x1b8] sm:$0xff]  ;;  %v1372_v40 = vld [vmem:[#allocation8 + $0xb0] sm:$0xff]  ;;  %v620_v43 = vperm.slane %v2237_v44, 6  ;;  %v1403_v49 = vld [vmem:[#allocation8 + $0x1a8] sm:$0xff] }
 0x121   :  { %1259 = vmatpush.msrb.mxu2 %v145_v46  ;;  %1279 = vmatpush.msrb.mxu3 %v401_v47  ;;  %v884_v59 = vadd.f32 %v883_v55, %v864_v50  ;;  %1338 = vst [vmem:[#allocation11 + $0x20] sm:$0xff] %v2273_v56  ;;  %v1388_v41 = vld [vmem:[#allocation8 + $0x130] sm:$0xff]  ;;  %v1371_v46 = vld [vmem:[#allocation8 + $0xa8] sm:$0xff]  ;;  %v1354_v50 = vld [vmem:[#allocation8 + $0x20] sm:$0xff] }
 0x122   :  { %1220 = vmatpush.msrb.mxu0 %v128_v51  ;;  %1240 = vmatpush.msrb.mxu1 %v384_v52  ;;  %v1404_v42 = vld [vmem:[#allocation8 + $0x1b0] sm:$0xff]  ;;  %v1387_v47 = vld [vmem:[#allocation8 + $0x128] sm:$0xff]  ;;  %v1370_v51 = vld [vmem:[#allocation8 + $0xa0] sm:$0xff] }
 0x123   :  { %1260 = vmatpush.msrb.mxu2 %v129_v53  ;;  %1280 = vmatpush.msrb.mxu3 %v385_v54  ;;  %vm1291_vm5 = vcmp.gt.f32.partialorder %v884_v59, 0.0  ;;  %v1307_v63 = vmul.f32 0.2, %v884_v59  ;;  %v1386_v53 = vld [vmem:[#allocation8 + $0x120] sm:$0xff] }
 0x124   :  { %1221 = vmatpush.msrb.mxu0 %v112_v57  ;;  %1241 = vmatpush.msrb.mxu1 %v368_v58  ;;  %v1402_v54 = vld [vmem:[#allocation8 + $0x1a0] sm:$0xff]  ;;  %v621_v58 = vperm.slane %v2237_v44, 7 }
 0x125   :  { %1261 = vmatpush.msrb.mxu2 %v113_v61  ;;  %1281 = vmatpush.msrb.mxu3 %v369_v62  ;;  %v2276_v5 = vsel %vm1291_vm5, %v884_v59, %v1307_v63  ;;  %v1353_v59 = vld [vmem:[#allocation8 + $0x18] sm:$0xff] }
 0x126   :  { %1222 = vmatmul.f32.vlgmr.msrb.gmra.mxu0 %v2244_v20  ;;  %1262 = vmatmul.f32.vlgmr.msrb.gmra.mxu2 %v2244_v20  ;;  %1339 = vst [vmem:[#allocation11 + $0x28] sm:$0xff] %v2276_v5  ;;  %v1411_v20 = vld [vmem:[#allocation8 + $0x1e8] sm:$0xff]  ;;  %v1369_v61 = vld [vmem:[#allocation8 + $0x98] sm:$0xff] }
 0x127   :  { %1610 = vmatpush.msra.mxu0 %v1365_v0  ;;  %1630 = vmatpush.msra.mxu1 %v1381_v2  ;;  %v1385_v62 = vld [vmem:[#allocation8 + $0x118] sm:$0xff]  ;;  %v1352_v2 = vld [vmem:[#allocation8 + $0x10] sm:$0xff] }
 0x128   :  { %1650 = vmatpush.msra.mxu2 %v1397_v3  ;;  %1670 = vmatpush.msra.mxu3 %v1413_v4  ;;  %v1401_v63 = vld [vmem:[#allocation8 + $0x198] sm:$0xff]  ;;  %v1368_v3 = vld [vmem:[#allocation8 + $0x90] sm:$0xff] }
 0x129   :  { %1242 = vmatmul.f32.vlgmr.msrb.gmra.mxu1 %v2248_v25  ;;  %1282 = vmatmul.f32.vlgmr.msrb.gmra.mxu3 %v2248_v25  ;;  %v1393_v25 = vld [vmem:[#allocation8 + $0x158] sm:$0xff] }
 0x12a   :  { %1611 = vmatpush.msra.mxu0 %v1364_v6  ;;  %1631 = vmatpush.msra.mxu1 %v1380_v7  ;;  %v1384_v6 = vld [vmem:[#allocation8 + $0x110] sm:$0xff] }
 0x12b   :  { %1651 = vmatpush.msra.mxu2 %v1396_v8  ;;  %1671 = vmatpush.msra.mxu3 %v1412_v9  ;;  %v1400_v7 = vld [vmem:[#allocation8 + $0x190] sm:$0xff]  ;;  %v1351_v9 = vld [vmem:[#allocation8 + $0x8] sm:$0xff] }
 0x12c   :  { %1612 = vmatpush.msra.mxu0 %v1363_v10  ;;  %1632 = vmatpush.msra.mxu1 %v1379_v11  ;;  %v1367_v10 = vld [vmem:[#allocation8 + $0x88] sm:$0xff] }
 0x12d   :  { %1652 = vmatpush.msra.mxu2 %v1395_v12  ;;  %1672 = vmatpush.msra.mxu3 %v1411_v20  ;;  %v1383_v11 = vld [vmem:[#allocation8 + $0x108] sm:$0xff] }
 0x12e   :  { %1613 = vmatpush.msra.mxu0 %v1362_v13  ;;  %1633 = vmatpush.msra.mxu1 %v1378_v14  ;;  %v1399_v12 = vld [vmem:[#allocation8 + $0x188] sm:$0xff]  ;;  %v1350_v14 = vld [vmem:[#allocation8] sm:$0xff] }
 0x12f   :  { %1653 = vmatpush.msra.mxu2 %v1394_v15  ;;  %1673 = vmatpush.msra.mxu3 %v1410_v16  ;;  %v1366_v15 = vld [vmem:[#allocation8 + $0x80] sm:$0xff] }
 0x130   :  { %1614 = vmatpush.msra.mxu0 %v1361_v17  ;;  %1634 = vmatpush.msra.mxu1 %v1377_v60  ;;  %v1382_v17 = vld [vmem:[#allocation8 + $0x100] sm:$0xff] }
 0x131   :  { %1654 = vmatpush.msra.mxu2 %v1393_v25  ;;  %1674 = vmatpush.msra.mxu3 %v1409_v19  ;;  %v1398_v60 = vld [vmem:[#allocation8 + $0x180] sm:$0xff]  ;;  %v1429_v19 = vld [vmem:[#allocation8 + $0x278] sm:$0xff] }
 0x132   :  { %1615 = vmatpush.msra.mxu0 %v1360_v1  ;;  %1635 = vmatpush.msra.mxu1 %v1376_v21  ;;  %v1445_v1 = vld [vmem:[#allocation8 + $0x2f8] sm:$0xff] }
 0x133   :  { %1655 = vmatpush.msra.mxu2 %v1392_v22  ;;  %1675 = vmatpush.msra.mxu3 %v1408_v23  ;;  %v1461_v22 = vld [vmem:[#allocation8 + $0x378] sm:$0xff] }
 0x134   :  { %1616 = vmatpush.msra.mxu0 %v1359_v24  ;;  %1636 = vmatpush.msra.mxu1 %v1375_v26  ;;  %v1477_v23 = vld [vmem:[#allocation8 + $0x3f8] sm:$0xff]  ;;  %v1428_v24 = vld [vmem:[#allocation8 + $0x270] sm:$0xff] }
 0x135   :  { %1656 = vmatpush.msra.mxu2 %v1391_v27  ;;  %1676 = vmatpush.msra.mxu3 %v1407_v29  ;;  %v1444_v26 = vld [vmem:[#allocation8 + $0x2f0] sm:$0xff] }
 0x136   :  { %1617 = vmatpush.msra.mxu0 %v1358_v30  ;;  %1637 = vmatpush.msra.mxu1 %v1374_v31  ;;  %v1460_v27 = vld [vmem:[#allocation8 + $0x370] sm:$0xff]  ;;  %v1427_v30 = vld [vmem:[#allocation8 + $0x268] sm:$0xff] }
 0x137   :  { %1657 = vmatpush.msra.mxu2 %v1390_v32  ;;  %1677 = vmatpush.msra.mxu3 %v1406_v33  ;;  %v1476_v29 = vld [vmem:[#allocation8 + $0x3f0] sm:$0xff]  ;;  %v1475_v31 = vld [vmem:[#allocation8 + $0x3e8] sm:$0xff]  ;;  %v1426_v32 = vld [vmem:[#allocation8 + $0x260] sm:$0xff] }
 0x138   :  { %1618 = vmatpush.msra.mxu0 %v1357_v35  ;;  %1638 = vmatpush.msra.mxu1 %v1373_v36  ;;  %v1474_v33 = vld [vmem:[#allocation8 + $0x3e0] sm:$0xff]  ;;  %v1425_v35 = vld [vmem:[#allocation8 + $0x258] sm:$0xff] }
 0x139   :  { %1658 = vmatpush.msra.mxu2 %v1389_v37  ;;  %1678 = vmatpush.msra.mxu3 %v1405_v38  ;;  %v1441_v36 = vld [vmem:[#allocation8 + $0x2d8] sm:$0xff] }
 0x13a   :  { %1619 = vmatpush.msra.mxu0 %v1356_v39  ;;  %1639 = vmatpush.msra.mxu1 %v1372_v40  ;;  %v1457_v37 = vld [vmem:[#allocation8 + $0x358] sm:$0xff]  ;;  %v1424_v39 = vld [vmem:[#allocation8 + $0x250] sm:$0xff] }
 0x13b   :  { %1659 = vmatpush.msra.mxu2 %v1388_v41  ;;  %1679 = vmatpush.msra.mxu3 %v1404_v42  ;;  %v903_v52 = vpop.f32.mrf.mxu0  ;;  %v1473_v38 = vld [vmem:[#allocation8 + $0x3d8] sm:$0xff]  ;;  %v1440_v40 = vld [vmem:[#allocation8 + $0x2d0] sm:$0xff] }
 0x13c   :  { %1620 = vmatpush.msra.mxu0 %v1355_v45  ;;  %1640 = vmatpush.msra.mxu1 %v1371_v46  ;;  %v904_v55 = vadd.f32 %v903_v52, %v620_v43  ;;  %v923_v57 = vpop.f32.mrf.mxu1  ;;  %v1456_v41 = vld [vmem:[#allocation8 + $0x350] sm:$0xff]  ;;  %v1423_v43 = vld [vmem:[#allocation8 + $0x248] sm:$0xff]  ;;  %v1470_v52 = vld [vmem:[#allocation8 + $0x3c0] sm:$0xff] }
 0x13d   :  { %1660 = vmatpush.msra.mxu2 %v1387_v47  ;;  %1680 = vmatpush.msra.mxu3 %v1403_v49  ;;  %v1472_v42 = vld [vmem:[#allocation8 + $0x3d0] sm:$0xff]  ;;  %v1439_v45 = vld [vmem:[#allocation8 + $0x2c8] sm:$0xff]  ;;  %v1422_v49 = vld [vmem:[#allocation8 + $0x240] sm:$0xff] }
 0x13e   :  { %1621 = vmatpush.msra.mxu0 %v1354_v50  ;;  %1641 = vmatpush.msra.mxu1 %v1370_v51  ;;  %v924_v0 = vadd.f32 %v923_v57, %v904_v55  ;;  %v1455_v46 = vld [vmem:[#allocation8 + $0x348] sm:$0xff]  ;;  %v1438_v50 = vld [vmem:[#allocation8 + $0x2c0] sm:$0xff]  ;;  %v2295_v55 = vld [vmem:[#allocation7 + $0x8] sm:$0xff] }
 0x13f   :  { %1661 = vmatpush.msra.mxu2 %v1386_v53  ;;  %1681 = vmatpush.msra.mxu3 %v1402_v54  ;;  %v943_v4 = vpop.f32.mrf.mxu2  ;;  %v1471_v47 = vld [vmem:[#allocation8 + $0x3c8] sm:$0xff]  ;;  %v1454_v51 = vld [vmem:[#allocation8 + $0x340] sm:$0xff]  ;;  %v1421_v53 = vld [vmem:[#allocation8 + $0x238] sm:$0xff] }
 0x140   :  { %1622 = vmatpush.msra.mxu0 %v1353_v59  ;;  %1642 = vmatpush.msra.mxu1 %v1369_v61  ;;  %vm1292_vm6 = vcmp.gt.f32.partialorder %v924_v0, 0.0  ;;  %v1308_v44 = vmul.f32 0.2, %v924_v0  ;;  %v944_v8 = vadd.f32 %v943_v4, %v621_v58  ;;  %v1437_v54 = vld [vmem:[#allocation8 + $0x2b8] sm:$0xff]  ;;  %v1420_v59 = vld [vmem:[#allocation8 + $0x230] sm:$0xff]  ;;  %v1451_v4 = vld [vmem:[#allocation8 + $0x328] sm:$0xff] }
 0x141   :  { %1662 = vmatpush.msra.mxu2 %v1385_v62  ;;  %1682 = vmatpush.msra.mxu3 %v1401_v63  ;;  %v1453_v57 = vld [vmem:[#allocation8 + $0x338] sm:$0xff]  ;;  %v1436_v61 = vld [vmem:[#allocation8 + $0x2b0] sm:$0xff] }
 0x142   :  { %1623 = vmatpush.msra.mxu0 %v1352_v2  ;;  %1643 = vmatpush.msra.mxu1 %v1368_v3  ;;  %v963_v20 = vpop.f32.mrf.mxu3  ;;  %v2285_v13 = vsel %vm1292_vm6, %v924_v0, %v1308_v44  ;;  %v1469_v58 = vld [vmem:[#allocation8 + $0x3b8] sm:$0xff]  ;;  %v1452_v62 = vld [vmem:[#allocation8 + $0x330] sm:$0xff]  ;;  %v622_v0 = vperm.slane %v2295_v55, 0  ;;  %v1419_v2 = vld [vmem:[#allocation8 + $0x228] sm:$0xff] }
 0x143   :  { %1663 = vmatpush.msra.mxu2 %v1384_v6  ;;  %1683 = vmatpush.msra.mxu3 %v1400_v7  ;;  %v964_v16 = vadd.f32 %v963_v20, %v944_v8  ;;  %1340 = vst [vmem:[#allocation11 + $0x30] sm:$0xff] %v2285_v13  ;;  %v1468_v63 = vld [vmem:[#allocation8 + $0x3b0] sm:$0xff]  ;;  %v1435_v3 = vld [vmem:[#allocation8 + $0x2a8] sm:$0xff]  ;;  %v1418_v7 = vld [vmem:[#allocation8 + $0x220] sm:$0xff]  ;;  %v623_v20 = vperm.slane %v2295_v55, 1 }
 0x144   :  { %1624 = vmatpush.msra.mxu0 %v1351_v9  ;;  %1644 = vmatpush.msra.mxu1 %v1367_v10  ;;  %v1467_v6 = vld [vmem:[#allocation8 + $0x3a8] sm:$0xff]  ;;  %v1434_v44 = vld [vmem:[#allocation8 + $0x2a0] sm:$0xff] }
 0x145   :  { %1664 = vmatpush.msra.mxu2 %v1383_v11  ;;  %1684 = vmatpush.msra.mxu3 %v1399_v12  ;;  %vm1293_vm7 = vcmp.gt.f32.partialorder %v964_v16, 0.0  ;;  %v1309_v25 = vmul.f32 0.2, %v964_v16  ;;  %v1450_v9 = vld [vmem:[#allocation8 + $0x320] sm:$0xff] }
 0x146   :  { %1625 = vmatpush.msra.mxu0 %v1350_v14  ;;  %1645 = vmatpush.msra.mxu1 %v1366_v15  ;;  %v1466_v10 = vld [vmem:[#allocation8 + $0x3a0] sm:$0xff]  ;;  %v1417_v14 = vld [vmem:[#allocation8 + $0x218] sm:$0xff] }
 0x147   :  { %1665 = vmatpush.msra.mxu2 %v1382_v17  ;;  %1685 = vmatpush.msra.mxu3 %v1398_v60  ;;  %v2288_v21 = vsel %vm1293_vm7, %v964_v16, %v1309_v25  ;;  %v1433_v15 = vld [vmem:[#allocation8 + $0x298] sm:$0xff]  ;;  %v1416_v25 = vld [vmem:[#allocation8 + $0x210] sm:$0xff] }
 0x148   :  { %1626 = vmatmul.f32.vlgmr.msra.gmra.mxu0 %v2241_v18  ;;  %1646 = vmatmul.f32.vlgmr.msra.gmra.mxu1 %v2252_v28  ;;  %1341 = vst [vmem:[#allocation11 + $0x38] sm:$0xff] %v2288_v21  ;;  %v1443_v18 = vld [vmem:[#allocation8 + $0x2e8] sm:$0xff]  ;;  %v1449_v16 = vld [vmem:[#allocation8 + $0x318] sm:$0xff] }
 0x149   :  { %1666 = vmatmul.f32.vlgmr.msra.gmra.mxu2 %v2261_v34  ;;  %1686 = vmatmul.f32.vlgmr.msra.gmra.mxu3 %v2264_v48  ;;  %v1459_v28 = vld [vmem:[#allocation8 + $0x368] sm:$0xff]  ;;  %v1442_v34 = vld [vmem:[#allocation8 + $0x2e0] sm:$0xff]  ;;  %v1465_v17 = vld [vmem:[#allocation8 + $0x398] sm:$0xff] }
 0x14a   :  { %1690 = vmatpush.msrb.mxu0 %v1429_v19  ;;  %1710 = vmatpush.msrb.mxu1 %v1445_v1  ;;  %v1458_v48 = vld [vmem:[#allocation8 + $0x360] sm:$0xff]  ;;  %v1432_v19 = vld [vmem:[#allocation8 + $0x290] sm:$0xff] }
 0x14b   :  { %1730 = vmatpush.msrb.mxu2 %v1461_v22  ;;  %1750 = vmatpush.msrb.mxu3 %v1477_v23  ;;  %v1448_v22 = vld [vmem:[#allocation8 + $0x310] sm:$0xff] }
 0x14c   :  { %1691 = vmatpush.msrb.mxu0 %v1428_v24  ;;  %1711 = vmatpush.msrb.mxu1 %v1444_v26  ;;  %v1464_v23 = vld [vmem:[#allocation8 + $0x390] sm:$0xff] }
 0x14d   :  { %1731 = vmatpush.msrb.mxu2 %v1460_v27  ;;  %1751 = vmatpush.msrb.mxu3 %v1476_v29  ;;  %v1415_v27 = vld [vmem:[#allocation8 + $0x208] sm:$0xff] }
 0x14e   :  { %1692 = vmatpush.msrb.mxu0 %v1427_v30  ;;  %1712 = vmatpush.msrb.mxu1 %v1443_v18  ;;  %v1431_v29 = vld [vmem:[#allocation8 + $0x288] sm:$0xff] }
 0x14f   :  { %1732 = vmatpush.msrb.mxu2 %v1459_v28  ;;  %1752 = vmatpush.msrb.mxu3 %v1475_v31  ;;  %v1447_v30 = vld [vmem:[#allocation8 + $0x308] sm:$0xff] }
 0x150   :  { %1693 = vmatpush.msrb.mxu0 %v1426_v32  ;;  %1713 = vmatpush.msrb.mxu1 %v1442_v34  ;;  %v1463_v18 = vld [vmem:[#allocation8 + $0x388] sm:$0xff]  ;;  %v1414_v32 = vld [vmem:[#allocation8 + $0x200] sm:$0xff] }
 0x151   :  { %1733 = vmatpush.msrb.mxu2 %v1458_v48  ;;  %1753 = vmatpush.msrb.mxu3 %v1474_v33  ;;  %v1430_v34 = vld [vmem:[#allocation8 + $0x280] sm:$0xff] }
 0x152   :  { %1694 = vmatpush.msrb.mxu0 %v1425_v35  ;;  %1714 = vmatpush.msrb.mxu1 %v1441_v36  ;;  %v1446_v33 = vld [vmem:[#allocation8 + $0x300] sm:$0xff] }
 0x153   :  { %1734 = vmatpush.msrb.mxu2 %v1457_v37  ;;  %1754 = vmatpush.msrb.mxu3 %v1473_v38  ;;  %v1462_v35 = vld [vmem:[#allocation8 + $0x380] sm:$0xff]  ;;  %v1493_v37 = vld [vmem:[#allocation8 + $0x478] sm:$0xff] }
 0x154   :  { %1695 = vmatpush.msrb.mxu0 %v1424_v39  ;;  %1715 = vmatpush.msrb.mxu1 %v1440_v40  ;;  %v1509_v38 = vld [vmem:[#allocation8 + $0x4f8] sm:$0xff] }
 0x155   :  { %1735 = vmatpush.msrb.mxu2 %v1456_v41  ;;  %1755 = vmatpush.msrb.mxu3 %v1472_v42  ;;  %v1525_v40 = vld [vmem:[#allocation8 + $0x578] sm:$0xff]  ;;  %v1492_v42 = vld [vmem:[#allocation8 + $0x470] sm:$0xff] }
 0x156   :  { %1696 = vmatpush.msrb.mxu0 %v1423_v43  ;;  %1716 = vmatpush.msrb.mxu1 %v1439_v45  ;;  %v1541_v41 = vld [vmem:[#allocation8 + $0x5f8] sm:$0xff]  ;;  %v1508_v43 = vld [vmem:[#allocation8 + $0x4f0] sm:$0xff] }
 0x157   :  { %1736 = vmatpush.msrb.mxu2 %v1455_v46  ;;  %1756 = vmatpush.msrb.mxu3 %v1471_v47  ;;  %v1524_v45 = vld [vmem:[#allocation8 + $0x570] sm:$0xff]  ;;  %v1491_v47 = vld [vmem:[#allocation8 + $0x468] sm:$0xff] }
 0x158   :  { %1697 = vmatpush.msrb.mxu0 %v1422_v49  ;;  %1717 = vmatpush.msrb.mxu1 %v1438_v50  ;;  %v1540_v46 = vld [vmem:[#allocation8 + $0x5f0] sm:$0xff]  ;;  %v1539_v49 = vld [vmem:[#allocation8 + $0x5e8] sm:$0xff]  ;;  %v1490_v50 = vld [vmem:[#allocation8 + $0x460] sm:$0xff] }
 0x159   :  { %1737 = vmatpush.msrb.mxu2 %v1454_v51  ;;  %1757 = vmatpush.msrb.mxu3 %v1470_v52  ;;  %v1538_v51 = vld [vmem:[#allocation8 + $0x5e0] sm:$0xff]  ;;  %v1489_v52 = vld [vmem:[#allocation8 + $0x458] sm:$0xff] }
 0x15a   :  { %1698 = vmatpush.msrb.mxu0 %v1421_v53  ;;  %1718 = vmatpush.msrb.mxu1 %v1437_v54  ;;  %v1505_v53 = vld [vmem:[#allocation8 + $0x4d8] sm:$0xff] }
 0x15b   :  { %1738 = vmatpush.msrb.mxu2 %v1453_v57  ;;  %1758 = vmatpush.msrb.mxu3 %v1469_v58  ;;  %v1521_v54 = vld [vmem:[#allocation8 + $0x558] sm:$0xff]  ;;  %v1488_v58 = vld [vmem:[#allocation8 + $0x450] sm:$0xff] }
 0x15c   :  { %1699 = vmatpush.msrb.mxu0 %v1420_v59  ;;  %1719 = vmatpush.msrb.mxu1 %v1436_v61  ;;  %v1537_v57 = vld [vmem:[#allocation8 + $0x5d8] sm:$0xff]  ;;  %v1504_v59 = vld [vmem:[#allocation8 + $0x4d0] sm:$0xff]  ;;  %v624_v61 = vperm.slane %v2295_v55, 2 }
 0x15d   :  { %1739 = vmatpush.msrb.mxu2 %v1452_v62  ;;  %1759 = vmatpush.msrb.mxu3 %v1468_v63  ;;  %v983_v8 = vpop.f32.mrf.mxu0  ;;  %v1520_v62 = vld [vmem:[#allocation8 + $0x550] sm:$0xff] }
 0x15e   :  { %1700 = vmatpush.msrb.mxu0 %v1419_v2  ;;  %1720 = vmatpush.msrb.mxu1 %v1435_v3  ;;  %v984_v11 = vadd.f32 %v983_v8, %v622_v0  ;;  %v1003_v12 = vpop.f32.mrf.mxu1  ;;  %v1536_v63 = vld [vmem:[#allocation8 + $0x5d0] sm:$0xff]  ;;  %v625_v0 = vperm.slane %v2295_v55, 3  ;;  %v1487_v2 = vld [vmem:[#allocation8 + $0x448] sm:$0xff]  ;;  %v1502_v8 = vld [vmem:[#allocation8 + $0x4c0] sm:$0xff] }
 0x15f   :  { %1740 = vmatpush.msrb.mxu2 %v1451_v4  ;;  %1760 = vmatpush.msrb.mxu3 %v1467_v6  ;;  %v1503_v3 = vld [vmem:[#allocation8 + $0x4c8] sm:$0xff] }
 0x160   :  { %1701 = vmatpush.msrb.mxu0 %v1418_v7  ;;  %1721 = vmatpush.msrb.mxu1 %v1434_v44  ;;  %v1004_v60 = vadd.f32 %v1003_v12, %v984_v11  ;;  %v1519_v4 = vld [vmem:[#allocation8 + $0x548] sm:$0xff]  ;;  %v1486_v44 = vld [vmem:[#allocation8 + $0x440] sm:$0xff] }
 0x161   :  { %1741 = vmatpush.msrb.mxu2 %v1450_v9  ;;  %1761 = vmatpush.msrb.mxu3 %v1466_v10  ;;  %v1023_v1 = vpop.f32.mrf.mxu2  ;;  %v1535_v6 = vld [vmem:[#allocation8 + $0x5c8] sm:$0xff]  ;;  %v1518_v11 = vld [vmem:[#allocation8 + $0x540] sm:$0xff] }
 0x162   :  { %1702 = vmatpush.msrb.mxu0 %v1417_v14  ;;  %1722 = vmatpush.msrb.mxu1 %v1433_v15  ;;  %vm1294_vm8 = vcmp.gt.f32.partialorder %v1004_v60, 0.0  ;;  %v1310_v24 = vmul.f32 0.2, %v1004_v60  ;;  %v1024_v26 = vadd.f32 %v1023_v1, %v623_v20  ;;  %v1534_v12 = vld [vmem:[#allocation8 + $0x5c0] sm:$0xff]  ;;  %v1485_v15 = vld [vmem:[#allocation8 + $0x438] sm:$0xff]  ;;  %v1484_v1 = vld [vmem:[#allocation8 + $0x430] sm:$0xff] }
 0x163   :  { %1742 = vmatpush.msrb.mxu2 %v1449_v16  ;;  %1762 = vmatpush.msrb.mxu3 %v1465_v17  ;;  %v1501_v16 = vld [vmem:[#allocation8 + $0x4b8] sm:$0xff] }
 0x164   :  { %1703 = vmatpush.msrb.mxu0 %v1416_v25  ;;  %1723 = vmatpush.msrb.mxu1 %v1432_v19  ;;  %v1043_v28 = vpop.f32.mrf.mxu3  ;;  %v2299_v31 = vsel %vm1294_vm8, %v1004_v60, %v1310_v24  ;;  %v1517_v60 = vld [vmem:[#allocation8 + $0x538] sm:$0xff] }
 0x165   :  { %1743 = vmatpush.msrb.mxu2 %v1448_v22  ;;  %1763 = vmatpush.msrb.mxu3 %v1464_v23  ;;  %v1044_v48 = vadd.f32 %v1043_v28, %v1024_v26  ;;  %1342 = vst [vmem:[#allocation11 + $0x40] sm:$0xff] %v2299_v31  ;;  %v1533_v25 = vld [vmem:[#allocation8 + $0x5b8] sm:$0xff]  ;;  %v1500_v22 = vld [vmem:[#allocation8 + $0x4b0] sm:$0xff] }
 0x166   :  { %1704 = vmatpush.msrb.mxu0 %v1415_v27  ;;  %1724 = vmatpush.msrb.mxu1 %v1431_v29  ;;  %v1516_v26 = vld [vmem:[#allocation8 + $0x530] sm:$0xff]  ;;  %v1483_v29 = vld [vmem:[#allocation8 + $0x428] sm:$0xff] }
 0x167   :  { %1744 = vmatpush.msrb.mxu2 %v1447_v30  ;;  %1764 = vmatpush.msrb.mxu3 %v1463_v18  ;;  %vm1295_vm9 = vcmp.gt.f32.partialorder %v1044_v48, 0.0  ;;  %v1311_v36 = vmul.f32 0.2, %v1044_v48  ;;  %v1532_v27 = vld [vmem:[#allocation8 + $0x5b0] sm:$0xff]  ;;  %v1499_v30 = vld [vmem:[#allocation8 + $0x4a8] sm:$0xff] }
 0x168   :  { %1705 = vmatpush.msrb.mxu0 %v1414_v32  ;;  %1725 = vmatpush.msrb.mxu1 %v1430_v34  ;;  %v1515_v32 = vld [vmem:[#allocation8 + $0x528] sm:$0xff] }
 0x169   :  { %1745 = vmatpush.msrb.mxu2 %v1446_v33  ;;  %1765 = vmatpush.msrb.mxu3 %v1462_v35  ;;  %v2302_v39 = vsel %vm1295_vm9, %v1044_v48, %v1311_v36  ;;  %v1531_v34 = vld [vmem:[#allocation8 + $0x5a8] sm:$0xff]  ;;  %v1482_v48 = vld [vmem:[#allocation8 + $0x420] sm:$0xff] }
 0x16a   :  { %1706 = vmatmul.f32.vlgmr.msrb.gmra.mxu0 %v2273_v56  ;;  %1726 = vmatmul.f32.vlgmr.msrb.gmra.mxu1 %v2276_v5  ;;  %1343 = vst [vmem:[#allocation11 + $0x48] sm:$0xff] %v2302_v39  ;;  %v1507_v56 = vld [vmem:[#allocation8 + $0x4e8] sm:$0xff]  ;;  %v1498_v33 = vld [vmem:[#allocation8 + $0x4a0] sm:$0xff] }
 0x16b   :  { %1746 = vmatmul.f32.vlgmr.msrb.gmra.mxu2 %v2285_v13  ;;  %1766 = vmatmul.f32.vlgmr.msrb.gmra.mxu3 %v2288_v21  ;;  %v1523_v5 = vld [vmem:[#allocation8 + $0x568] sm:$0xff]  ;;  %v1506_v13 = vld [vmem:[#allocation8 + $0x4e0] sm:$0xff] }
 0x16c   :  { %1770 = vmatpush.msra.mxu0 %v1493_v37  ;;  %1790 = vmatpush.msra.mxu1 %v1509_v38  ;;  %v1522_v21 = vld [vmem:[#allocation8 + $0x560] sm:$0xff]  ;;  %v1481_v38 = vld [vmem:[#allocation8 + $0x418] sm:$0xff] }
 0x16d   :  { %1810 = vmatpush.msra.mxu2 %v1525_v40  ;;  %1830 = vmatpush.msra.mxu3 %v1541_v41  ;;  %v1514_v36 = vld [vmem:[#allocation8 + $0x520] sm:$0xff]  ;;  %v1497_v40 = vld [vmem:[#allocation8 + $0x498] sm:$0xff] }
 0x16e   :  { %1771 = vmatpush.msra.mxu0 %v1492_v42  ;;  %1791 = vmatpush.msra.mxu1 %v1508_v43  ;;  %v1530_v37 = vld [vmem:[#allocation8 + $0x5a0] sm:$0xff]  ;;  %v1513_v41 = vld [vmem:[#allocation8 + $0x518] sm:$0xff]  ;;  %v1480_v43 = vld [vmem:[#allocation8 + $0x410] sm:$0xff] }
 0x16f   :  { %1811 = vmatpush.msra.mxu2 %v1524_v45  ;;  %1831 = vmatpush.msra.mxu3 %v1540_v46  ;;  %v1529_v42 = vld [vmem:[#allocation8 + $0x598] sm:$0xff]  ;;  %v1496_v45 = vld [vmem:[#allocation8 + $0x490] sm:$0xff] }
 0x170   :  { %1772 = vmatpush.msra.mxu0 %v1491_v47  ;;  %1792 = vmatpush.msra.mxu1 %v1507_v56  ;;  %v1512_v46 = vld [vmem:[#allocation8 + $0x510] sm:$0xff]  ;;  %v1479_v56 = vld [vmem:[#allocation8 + $0x408] sm:$0xff] }
 0x171   :  { %1812 = vmatpush.msra.mxu2 %v1523_v5  ;;  %1832 = vmatpush.msra.mxu3 %v1539_v49  ;;  %v1528_v47 = vld [vmem:[#allocation8 + $0x590] sm:$0xff]  ;;  %v1495_v5 = vld [vmem:[#allocation8 + $0x488] sm:$0xff] }
 0x172   :  { %1773 = vmatpush.msra.mxu0 %v1490_v50  ;;  %1793 = vmatpush.msra.mxu1 %v1506_v13  ;;  %v1511_v49 = vld [vmem:[#allocation8 + $0x508] sm:$0xff]  ;;  %v1478_v13 = vld [vmem:[#allocation8 + $0x400] sm:$0xff] }
 0x173   :  { %1813 = vmatpush.msra.mxu2 %v1522_v21  ;;  %1833 = vmatpush.msra.mxu3 %v1538_v51  ;;  %v1527_v50 = vld [vmem:[#allocation8 + $0x588] sm:$0xff]  ;;  %v1494_v21 = vld [vmem:[#allocation8 + $0x480] sm:$0xff] }
 0x174   :  { %1774 = vmatpush.msra.mxu0 %v1489_v52  ;;  %1794 = vmatpush.msra.mxu1 %v1505_v53  ;;  %v1510_v51 = vld [vmem:[#allocation8 + $0x500] sm:$0xff]  ;;  %v1557_v52 = vld [vmem:[#allocation8 + $0x678] sm:$0xff] }
 0x175   :  { %1814 = vmatpush.msra.mxu2 %v1521_v54  ;;  %1834 = vmatpush.msra.mxu3 %v1537_v57  ;;  %v1526_v53 = vld [vmem:[#allocation8 + $0x580] sm:$0xff]  ;;  %v1573_v54 = vld [vmem:[#allocation8 + $0x6f8] sm:$0xff]  ;;  %v1556_v57 = vld [vmem:[#allocation8 + $0x670] sm:$0xff] }
 0x176   :  { %1775 = vmatpush.msra.mxu0 %v1488_v58  ;;  %1795 = vmatpush.msra.mxu1 %v1504_v59  ;;  %v1063_v7 = vpop.f32.mrf.mxu0  ;;  %v1589_v58 = vld [vmem:[#allocation8 + $0x778] sm:$0xff]  ;;  %v1572_v59 = vld [vmem:[#allocation8 + $0x6f0] sm:$0xff] }
 0x177   :  { %1815 = vmatpush.msra.mxu2 %v1520_v62  ;;  %1835 = vmatpush.msra.mxu3 %v1536_v63  ;;  %v1064_v9 = vadd.f32 %v1063_v7, %v624_v61  ;;  %v1103_v10 = vpop.f32.mrf.mxu2  ;;  %v1605_v61 = vld [vmem:[#allocation8 + $0x7f8] sm:$0xff]  ;;  %v1555_v62 = vld [vmem:[#allocation8 + $0x668] sm:$0xff]  ;;  %v1588_v63 = vld [vmem:[#allocation8 + $0x770] sm:$0xff] }
 0x178   :  { %1776 = vmatpush.msra.mxu0 %v1487_v2  ;;  %1796 = vmatpush.msra.mxu1 %v1503_v3  ;;  %v1083_v20 = vpop.f32.mrf.mxu1  ;;  %v1104_v14 = vadd.f32 %v1103_v10, %v625_v0  ;;  %v1571_v0 = vld [vmem:[#allocation8 + $0x6e8] sm:$0xff]  ;;  %v1604_v2 = vld [vmem:[#allocation8 + $0x7f0] sm:$0xff]  ;;  %v1586_v7 = vld [vmem:[#allocation8 + $0x760] sm:$0xff] }
 0x179   :  { %1816 = vmatpush.msra.mxu2 %v1519_v4  ;;  %1836 = vmatpush.msra.mxu3 %v1535_v6  ;;  %v1084_v17 = vadd.f32 %v1083_v20, %v1064_v9  ;;  %v1587_v3 = vld [vmem:[#allocation8 + $0x768] sm:$0xff]  ;;  %v1553_v6 = vld [vmem:[#allocation8 + $0x658] sm:$0xff]  ;;  %v1552_v9 = vld [vmem:[#allocation8 + $0x650] sm:$0xff] }
 0x17a   :  { %1777 = vmatpush.msra.mxu0 %v1486_v44  ;;  %1797 = vmatpush.msra.mxu1 %v1502_v8  ;;  %v1123_v19 = vpop.f32.mrf.mxu3  ;;  %v1603_v4 = vld [vmem:[#allocation8 + $0x7e8] sm:$0xff]  ;;  %v1569_v44 = vld [vmem:[#allocation8 + $0x6d8] sm:$0xff]  ;;  %v1602_v8 = vld [vmem:[#allocation8 + $0x7e0] sm:$0xff] }
 0x17b   :  { %1817 = vmatpush.msra.mxu2 %v1518_v11  ;;  %1837 = vmatpush.msra.mxu3 %v1534_v12  ;;  %vm1296_vm10 = vcmp.gt.f32.partialorder %v1084_v17, 0.0  ;;  %v1312_v23 = vmul.f32 0.2, %v1084_v17  ;;  %v1124_v24 = vadd.f32 %v1123_v19, %v1104_v14  ;;  %v1585_v10 = vld [vmem:[#allocation8 + $0x758] sm:$0xff]  ;;  %v1568_v11 = vld [vmem:[#allocation8 + $0x6d0] sm:$0xff]  ;;  %v626_v12 = vperm.slane %v2295_v55, 4 }
 0x17c   :  { %1778 = vmatpush.msra.mxu0 %v1485_v15  ;;  %1798 = vmatpush.msra.mxu1 %v1501_v16  ;;  %v1601_v20 = vld [vmem:[#allocation8 + $0x7d8] sm:$0xff]  ;;  %v1551_v14 = vld [vmem:[#allocation8 + $0x648] sm:$0xff]  ;;  %v1584_v15 = vld [vmem:[#allocation8 + $0x750] sm:$0xff]  ;;  %v627_v16 = vperm.slane %v2295_v55, 5 }
 0x17d   :  { %1818 = vmatpush.msra.mxu2 %v1517_v60  ;;  %1838 = vmatpush.msra.mxu3 %v1533_v25  ;;  %vm1297_vm11 = vcmp.gt.f32.partialorder %v1124_v24, 0.0  ;;  %v1313_v18 = vmul.f32 0.2, %v1124_v24  ;;  %v1328_v28 = vsel %vm1296_vm10, %v1084_v17, %v1312_v23  ;;  %v1567_v17 = vld [vmem:[#allocation8 + $0x6c8] sm:$0xff]  ;;  %v1600_v60 = vld [vmem:[#allocation8 + $0x7d0] sm:$0xff]  ;;  %v1550_v25 = vld [vmem:[#allocation8 + $0x640] sm:$0xff] }
 0x17e   :  { %1779 = vmatpush.msra.mxu0 %v1484_v1  ;;  %1799 = vmatpush.msra.mxu1 %v1500_v22  ;;  %1344 = vst [vmem:[#allocation11 + $0x50] sm:$0xff] %v1328_v28  ;;  %v1583_v19 = vld [vmem:[#allocation8 + $0x748] sm:$0xff]  ;;  %v1566_v22 = vld [vmem:[#allocation8 + $0x6c0] sm:$0xff] }
 0x17f   :  { %1819 = vmatpush.msra.mxu2 %v1516_v26  ;;  %1839 = vmatpush.msra.mxu3 %v1532_v27  ;;  %v1329_v35 = vsel %vm1297_vm11, %v1124_v24, %v1313_v18  ;;  %v1599_v26 = vld [vmem:[#allocation8 + $0x7c8] sm:$0xff]  ;;  %v1549_v27 = vld [vmem:[#allocation8 + $0x638] sm:$0xff] }
 0x180   :  { %1780 = vmatpush.msra.mxu0 %v1483_v29  ;;  %1800 = vmatpush.msra.mxu1 %v1499_v30  ;;  %1345 = vst [vmem:[#allocation11 + $0x58] sm:$0xff] %v1329_v35  ;;  %v1582_v29 = vld [vmem:[#allocation8 + $0x740] sm:$0xff] }
 0x181   :  { %1820 = vmatpush.msra.mxu2 %v1515_v32  ;;  %1840 = vmatpush.msra.mxu3 %v1531_v34  ;;  %v1598_v34 = vld [vmem:[#allocation8 + $0x7c0] sm:$0xff] }
 0x182   :  { %1781 = vmatpush.msra.mxu0 %v1482_v48  ;;  %1801 = vmatpush.msra.mxu1 %v1498_v33  ;;  %v1548_v48 = vld [vmem:[#allocation8 + $0x630] sm:$0xff]  ;;  %v1581_v33 = vld [vmem:[#allocation8 + $0x738] sm:$0xff] }
 0x183   :  { %1821 = vmatpush.msra.mxu2 %v1514_v36  ;;  %1841 = vmatpush.msra.mxu3 %v1530_v37  ;;  %v1564_v36 = vld [vmem:[#allocation8 + $0x6b0] sm:$0xff] }
 0x184   :  { %1782 = vmatpush.msra.mxu0 %v1481_v38  ;;  %1802 = vmatpush.msra.mxu1 %v1497_v40  ;;  %v1597_v40 = vld [vmem:[#allocation8 + $0x7b8] sm:$0xff] }
 0x185   :  { %1822 = vmatpush.msra.mxu2 %v1513_v41  ;;  %1842 = vmatpush.msra.mxu3 %v1529_v42  ;;  %v1547_v41 = vld [vmem:[#allocation8 + $0x628] sm:$0xff]  ;;  %v1580_v42 = vld [vmem:[#allocation8 + $0x730] sm:$0xff] }
 0x186   :  { %1783 = vmatpush.msra.mxu0 %v1480_v43  ;;  %1803 = vmatpush.msra.mxu1 %v1496_v45  ;;  %v1563_v43 = vld [vmem:[#allocation8 + $0x6a8] sm:$0xff] }
 0x187   :  { %1823 = vmatpush.msra.mxu2 %v1512_v46  ;;  %1843 = vmatpush.msra.mxu3 %v1528_v47  ;;  %v1596_v47 = vld [vmem:[#allocation8 + $0x7b0] sm:$0xff] }
 0x188   :  { %1784 = vmatpush.msra.mxu0 %v1479_v56  ;;  %1804 = vmatpush.msra.mxu1 %v1495_v5  ;;  %v1546_v56 = vld [vmem:[#allocation8 + $0x620] sm:$0xff]  ;;  %v1579_v5 = vld [vmem:[#allocation8 + $0x728] sm:$0xff] }
 0x189   :  { %1824 = vmatpush.msra.mxu2 %v1511_v49  ;;  %1844 = vmatpush.msra.mxu3 %v1527_v50  ;;  %v628_v49 = vperm.slane %v2295_v55, 6  ;;  %v1562_v50 = vld [vmem:[#allocation8 + $0x6a0] sm:$0xff] }
 0x18a   :  { %1785 = vmatpush.msra.mxu0 %v1478_v13  ;;  %1805 = vmatpush.msra.mxu1 %v1494_v21  ;;  %v1595_v21 = vld [vmem:[#allocation8 + $0x7a8] sm:$0xff] }
 0x18b   :  { %1825 = vmatpush.msra.mxu2 %v1510_v51  ;;  %1786 = vmatmul.f32.vlgmr.msra.gmra.mxu0 %v2299_v31  ;;  %v1554_v31 = vld [vmem:[#allocation8 + $0x660] sm:$0xff]  ;;  %v1545_v51 = vld [vmem:[#allocation8 + $0x618] sm:$0xff] }
 0x18c   :  { %1806 = vmatmul.f32.vlgmr.msra.gmra.mxu1 %v2302_v39  ;;  %1826 = vmatmul.f32.vlgmr.msra.gmra.mxu2 %v1328_v28  ;;  %v1570_v39 = vld [vmem:[#allocation8 + $0x6e0] sm:$0xff]  ;;  %v1565_v28 = vld [vmem:[#allocation8 + $0x6b8] sm:$0xff] }
 0x18d   :  { %1850 = vmatpush.msrb.mxu0 %v1557_v52  ;;  %1845 = vmatpush.msra.mxu3 %v1526_v53  ;;  %v1578_v52 = vld [vmem:[#allocation8 + $0x720] sm:$0xff]  ;;  %v1561_v53 = vld [vmem:[#allocation8 + $0x698] sm:$0xff] }
 0x18e   :  { %1846 = vmatmul.f32.vlgmr.msra.gmra.mxu3 %v1329_v35  ;;  %1870 = vmatpush.msrb.mxu1 %v1573_v54 }
 0x18f   :  { %1851 = vmatpush.msrb.mxu0 %v1556_v57  ;;  %1890 = vmatpush.msrb.mxu2 %v1589_v58  ;;  %v1594_v57 = vld [vmem:[#allocation8 + $0x7a0] sm:$0xff]  ;;  %v1544_v58 = vld [vmem:[#allocation8 + $0x610] sm:$0xff] }
 0x190   :  { %1871 = vmatpush.msrb.mxu1 %v1572_v59  ;;  %1910 = vmatpush.msrb.mxu3 %v1605_v61  ;;  %v1577_v61 = vld [vmem:[#allocation8 + $0x718] sm:$0xff] }
 0x191   :  { %1852 = vmatpush.msrb.mxu0 %v1555_v62  ;;  %1891 = vmatpush.msrb.mxu2 %v1588_v63  ;;  %v1560_v62 = vld [vmem:[#allocation8 + $0x690] sm:$0xff]  ;;  %v1593_v63 = vld [vmem:[#allocation8 + $0x798] sm:$0xff] }
 0x192   :  { %1872 = vmatpush.msrb.mxu1 %v1571_v0  ;;  %1911 = vmatpush.msrb.mxu3 %v1604_v2  ;;  %v1543_v0 = vld [vmem:[#allocation8 + $0x608] sm:$0xff] }
 0x193   :  { %1853 = vmatpush.msrb.mxu0 %v1554_v31  ;;  %1892 = vmatpush.msrb.mxu2 %v1587_v3  ;;  %v1576_v31 = vld [vmem:[#allocation8 + $0x710] sm:$0xff]  ;;  %v629_v3 = vperm.slane %v2295_v55, 7 }
 0x194   :  { %1873 = vmatpush.msrb.mxu1 %v1570_v39  ;;  %1912 = vmatpush.msrb.mxu3 %v1603_v4  ;;  %v1559_v39 = vld [vmem:[#allocation8 + $0x688] sm:$0xff] }
 0x195   :  { %1854 = vmatpush.msrb.mxu0 %v1553_v6  ;;  %1893 = vmatpush.msrb.mxu2 %v1586_v7  ;;  %v1592_v6 = vld [vmem:[#allocation8 + $0x790] sm:$0xff]  ;;  %v1542_v7 = vld [vmem:[#allocation8 + $0x600] sm:$0xff] }
 0x196   :  { %1874 = vmatpush.msrb.mxu1 %v1569_v44  ;;  %1913 = vmatpush.msrb.mxu3 %v1602_v8  ;;  %v1575_v44 = vld [vmem:[#allocation8 + $0x708] sm:$0xff]  ;;  %v1558_v8 = vld [vmem:[#allocation8 + $0x680] sm:$0xff] }
 0x197   :  { %1855 = vmatpush.msrb.mxu0 %v1552_v9  ;;  %1894 = vmatpush.msrb.mxu2 %v1585_v10 }
 0x198   :  { %1875 = vmatpush.msrb.mxu1 %v1568_v11  ;;  %v1143_v1 = vpop.f32.mrf.mxu0  ;;  %1914 = vmatpush.msrb.mxu3 %v1601_v20  ;;  %v1591_v20 = vld [vmem:[#allocation8 + $0x788] sm:$0xff] }
 0x199   :  { %1856 = vmatpush.msrb.mxu0 %v1551_v14  ;;  %1895 = vmatpush.msrb.mxu2 %v1584_v15  ;;  %v1144_v23 = vadd.f32 %v1143_v1, %v626_v12  ;;  %v1183_v24 = vpop.f32.mrf.mxu2  ;;  %v1574_v12 = vld [vmem:[#allocation8 + $0x700] sm:$0xff] }
 0x19a   :  { %1876 = vmatpush.msrb.mxu1 %v1567_v17  ;;  %v1163_v30 = vpop.f32.mrf.mxu1  ;;  %v1184_v18 = vadd.f32 %v1183_v24, %v627_v16  ;;  %1915 = vmatpush.msrb.mxu3 %v1600_v60  ;;  %v1590_v16 = vld [vmem:[#allocation8 + $0x780] sm:$0xff] }
 0x19b   :  { %1857 = vmatpush.msrb.mxu0 %v1550_v25  ;;  %1896 = vmatpush.msrb.mxu2 %v1583_v19  ;;  %v1164_v32 = vadd.f32 %v1163_v30, %v1144_v23  ;;  %v1976_v25 = vld [vmem:[#allocation10] ss:$0 sm:$0xff] }
 0x19c   :  { %1877 = vmatpush.msrb.mxu1 %v1566_v22  ;;  %v1203_v35 = vpop.f32.mrf.mxu3  ;;  %1916 = vmatpush.msrb.mxu3 %v1599_v26 }
 0x19d   :  { %1858 = vmatpush.msrb.mxu0 %v1549_v27  ;;  %1897 = vmatpush.msrb.mxu2 %v1582_v29  ;;  %vm1298_vm12 = vcmp.gt.f32.partialorder %v1164_v32, 0.0  ;;  %v1314_v37 = vmul.f32 0.2, %v1164_v32  ;;  %v1204_v38 = vadd.f32 %v1203_v35, %v1184_v18 }
 0x19e   :  { %1878 = vmatpush.msrb.mxu1 %v1565_v28  ;;  %1917 = vmatpush.msrb.mxu3 %v1598_v34 }
 0x19f   :  { %1859 = vmatpush.msrb.mxu0 %v1548_v48  ;;  %1898 = vmatpush.msrb.mxu2 %v1581_v33  ;;  %vm1299_vm13 = vcmp.gt.f32.partialorder %v1204_v38, 0.0  ;;  %v1315_v45 = vmul.f32 0.2, %v1204_v38  ;;  %v1330_v46 = vsel %vm1298_vm12, %v1164_v32, %v1314_v37 }
 0x1a0   :  { %1879 = vmatpush.msrb.mxu1 %v1564_v36  ;;  %1346 = vst [vmem:[#allocation11 + $0x60] sm:$0xff] %v1330_v46  ;;  %1918 = vmatpush.msrb.mxu3 %v1597_v40 }
 0x1a1   :  { %1860 = vmatpush.msrb.mxu0 %v1547_v41  ;;  %1899 = vmatpush.msrb.mxu2 %v1580_v42  ;;  %v1331_v13 = vsel %vm1299_vm13, %v1204_v38, %v1315_v45 }
 0x1a2   :  { %1880 = vmatpush.msrb.mxu1 %v1563_v43  ;;  %1347 = vst [vmem:[#allocation11 + $0x68] sm:$0xff] %v1331_v13  ;;  %1919 = vmatpush.msrb.mxu3 %v1596_v47 }
 0x1a3   :  { %1861 = vmatpush.msrb.mxu0 %v1546_v56  ;;  %1900 = vmatpush.msrb.mxu2 %v1579_v5  ;;  %v1223_v54 = vpop.f32.mrf.mxu0 }
 0x1a4   :  { %1881 = vmatpush.msrb.mxu1 %v1562_v50  ;;  %v1224_v59 = vadd.f32 %v1223_v54, %v628_v49  ;;  %1920 = vmatpush.msrb.mxu3 %v1595_v21 }
 0x1a5   :  { %1862 = vmatpush.msrb.mxu0 %v1545_v51  ;;  %1901 = vmatpush.msrb.mxu2 %v1578_v52 }
 0x1a6   :  { %1882 = vmatpush.msrb.mxu1 %v1561_v53  ;;  %v1243_v2 = vpop.f32.mrf.mxu1  ;;  %1921 = vmatpush.msrb.mxu3 %v1594_v57 }
 0x1a7   :  { %1863 = vmatpush.msrb.mxu0 %v1544_v58  ;;  %1902 = vmatpush.msrb.mxu2 %v1577_v61  ;;  %v1244_v4 = vadd.f32 %v1243_v2, %v1224_v59 }
 0x1a8   :  { %1883 = vmatpush.msrb.mxu1 %v1560_v62  ;;  %1922 = vmatpush.msrb.mxu3 %v1593_v63 }
 0x1a9   :  { %1864 = vmatpush.msrb.mxu0 %v1543_v0  ;;  %vm1300_vm14 = vcmp.gt.f32.partialorder %v1244_v4, 0.0  ;;  %v1316_v9 = vmul.f32 0.2, %v1244_v4  ;;  %1903 = vmatpush.msrb.mxu2 %v1576_v31  ;;  %v1263_v10 = vpop.f32.mrf.mxu2 }
 0x1aa   :  { %1884 = vmatpush.msrb.mxu1 %v1559_v39  ;;  %v1264_v11 = vadd.f32 %v1263_v10, %v629_v3  ;;  %1923 = vmatpush.msrb.mxu3 %v1592_v6 }
 0x1ab   :  { %1865 = vmatpush.msrb.mxu0 %v1542_v7  ;;  %1904 = vmatpush.msrb.mxu2 %v1575_v44  ;;  %v1332_v55 = vsel %vm1300_vm14, %v1244_v4, %v1316_v9 }
 0x1ac   :  { %1866 = vmatmul.f32.vlgmr.msrb.gmra.mxu0 %v1330_v46  ;;  %1885 = vmatpush.msrb.mxu1 %v1558_v8  ;;  %v1283_v14 = vpop.f32.mrf.mxu3  ;;  %1348 = vst [vmem:[#allocation11 + $0x70] sm:$0xff] %v1332_v55 }
 0x1ad   :  { %1886 = vmatmul.f32.vlgmr.msrb.gmra.mxu1 %v1331_v13  ;;  %1905 = vmatpush.msrb.mxu2 %v1574_v12  ;;  %v1284_v15 = vadd.f32 %v1283_v14, %v1264_v11 }
 0x1ae   :  { %1906 = vmatmul.f32.vlgmr.msrb.gmra.mxu2 %v1332_v55  ;;  %1924 = vmatpush.msrb.mxu3 %v1591_v20 }
 0x1af   :  { %vm1301_vm15 = vcmp.gt.f32.partialorder %v1284_v15, 0.0  ;;  %v1317_v17 = vmul.f32 0.2, %v1284_v15 }
 0x1b0   :  { %1925 = vmatpush.msrb.mxu3 %v1590_v16 }
 0x1b1   :  { %v1333_v60 = vsel %vm1301_vm15, %v1284_v15, %v1317_v17 }
 0x1b2   :  { %1349 = vst [vmem:[#allocation11 + $0x78] sm:$0xff] %v1333_v60  ;;  %1926 = vmatmul.f32.vlgmr.msrb.gmra.mxu3 %v1333_v60 }
 0x1b3   :  { %1941 = dma.vmem_to_hbm [thread:$0]  %s1937_s24, 2048, %s1939_s22, [#allocation4]  }
 0x1c5   :  { %v1627_v19 = vpop.f32.mrf.mxu0  ;;  %v1647_v22 = vpop.f32.mrf.mxu1 }
 0x1c6   :  { %v1628_v1 = vadd.f32 %v1976_v25, %v1627_v19 }
 0x1c8   :  { %v1648_v24 = vadd.f32 %v1647_v22, %v1628_v1 }
 0x1cc   :  { %v1667_v23 = vpop.f32.mrf.mxu2  ;;  %v1687_v27 = vpop.f32.mrf.mxu3 }
 0x1cd   :  { %v1668_v26 = vadd.f32 %v1667_v23, %v1648_v24 }
 0x1cf   :  { %v1688_v30 = vadd.f32 %v1687_v27, %v1668_v26 }
 0x1e7   :  { %v1707_v29 = vpop.f32.mrf.mxu0  ;;  %v1727_v28 = vpop.f32.mrf.mxu1 }
 0x1e8   :  { %v1708_v18 = vadd.f32 %v1707_v29, %v1688_v30 }
 0x1ea   :  { %v1728_v34 = vadd.f32 %v1727_v28, %v1708_v18 }
 0x1ee   :  { %v1747_v32 = vpop.f32.mrf.mxu2  ;;  %v1767_v33 = vpop.f32.mrf.mxu3 }
 0x1ef   :  { %v1748_v48 = vadd.f32 %v1747_v32, %v1728_v34 }
 0x1f1   :  { %v1768_v36 = vadd.f32 %v1767_v33, %v1748_v48 }
 0x208   :  { %v1787_v35 = vpop.f32.mrf.mxu0 }
 0x209   :  { %v1788_v37 = vadd.f32 %v1787_v35, %v1768_v36  ;;  %v1807_v38 = vpop.f32.mrf.mxu1 }
 0x20b   :  { %v1808_v41 = vadd.f32 %v1807_v38, %v1788_v37 }
 0x20f   :  { %v1827_v40 = vpop.f32.mrf.mxu2 }
 0x210   :  { %v1828_v42 = vadd.f32 %v1827_v40, %v1808_v41 }
 0x211   :  { %v1847_v43 = vpop.f32.mrf.mxu3 }
 0x212   :  { %v1848_v46 = vadd.f32 %v1847_v43, %v1828_v42 }
 0x229   :  { %v1867_v45 = vpop.f32.mrf.mxu0 }
 0x22a   :  { %v1868_v47 = vadd.f32 %v1867_v45, %v1848_v46  ;;  %v1887_v56 = vpop.f32.mrf.mxu1 }
 0x22c   :  { %v1888_v49 = vadd.f32 %v1887_v56, %v1868_v47 }
 0x231   :  { %v1907_v5 = vpop.f32.mrf.mxu2 }
 0x232   :  { %v1908_v50 = vadd.f32 %v1907_v5, %v1888_v49 }
 0x235   :  { %v1927_v13 = vpop.f32.mrf.mxu3 }
 0x236   :  { %v1928_v21 = vadd.f32 %v1927_v13, %v1908_v50 }
 0x238   :  { %1930 = vst [vmem:[#allocation12] sm:$0xff] %v1928_v21 }
 0x239   :  { %1952 = dma.vmem_to_hbm [thread:$0]  %s1948_s25, 128, %s1950_s28, [#allocation13]  }
 0x23a   :  { %2153 = dma.done.wait [#allocation4], 2048  }
 0x23b   :  { %2154 = vsyncadd [#allocation4], 4294965248 }
 0x23c   :  { %2155 = dma.done.wait [#allocation13], 128  }
 0x23d   :  { %2156 = vsyncadd [#allocation13], 4294967168 }
 0x23e   :  { %1961 = vsyncpa [#allocation3], 1 }
 0x23f   :  { %1962 = vsyncpa [#allocation6], 1 }
 0x240   :  { %1963 = vsyncpa [#allocation9], 1 }
 0x241   :  { %1964 = vsyncpa [#allocation4], 1 }
 0x242   :  { %1965 = vsyncpa [#allocation13], 1 }

</bundles_post_ra>
